<compile_context>
chip_gen: v6e
topology: v6e:2x2x1
jax: 0.10.0
libtpu: 0.0.40
codegen_flags: <defaults>
</compile_context>

<pallas_src>
import math
import numpy as np
import jax
import jax.numpy as jnp
from jax import lax
from jax.experimental import pallas as pl
from jax.experimental.pallas import tpu as pltpu

# ---------------- config (small, consistent with the module) ----------------
B = 2          # batch
T = 8          # sequence length (== block_size)
C = 32         # n_embd
H = 4          # n_head
D = C // H     # head dim
BT = B * T
BH = B * H
LN_EPS = 1e-5
GELU_K = math.sqrt(2.0 / math.pi)
NEG_INF = -1e30


def _layernorm(v, g, b):
    # f32 elementwise math (VPU/EUP); g, b are (1, C) rows -> broadcast.
    mu = jnp.mean(v, axis=-1, keepdims=True)
    var = jnp.mean((v - mu) ** 2, axis=-1, keepdims=True)
    return (v - mu) * lax.rsqrt(var + LN_EPS) * g + b


def block_kernel(x_ref,
                 ln1_w_ref, ln1_b_ref,
                 wqkv_ref, bqkv_ref, wproj_ref, bproj_ref,
                 ln2_w_ref, ln2_b_ref,
                 wfc_ref, bfc_ref, wfp_ref, bfp_ref,
                 o_ref):
    bf16 = jnp.bfloat16
    x = x_ref[...]                                            # (BT, C) f32

    # ---- LN1 + fused head-major QKV projection (bf16 MXU / f32 acc) ----
    h1 = _layernorm(x, ln1_w_ref[...], ln1_b_ref[...])       # (BT, C)
    qkv = jnp.dot(h1.astype(bf16), wqkv_ref[...],
                  preferred_element_type=jnp.float32) + bqkv_ref[...]   # (BT, 3C)
    # 1/sqrt(D) already folded into the Q columns (wrapper); columns are
    # head-major: [q_0|k_0|v_0 | q_1|k_1|v_1 | ...].

    # Causal mask shared by every (batch, head) pair.
    row = lax.broadcasted_iota(jnp.int32, (T, T), 0)
    col = lax.broadcasted_iota(jnp.int32, (T, T), 1)
    causal = col <= row                                       # (T, T)

    # ---- pass 1: per-(batch, head) masked score tiles, bf16 operands ----
    scores = []
    vals = []
    for b in range(B):
        r0 = b * T
        qkv_b = qkv[r0:r0 + T, :].astype(bf16)                # cast once per batch
        for hh in range(H):
            c0 = hh * 3 * D                                   # contiguous 24-lane head slab
            q = qkv_b[:, c0:c0 + D]                           # (T, D) pre-scaled
            k = qkv_b[:, c0 + D:c0 + 2 * D]                   # (T, D)
            vals.append(qkv_b[:, c0 + 2 * D:c0 + 3 * D])      # (T, D)
            # q @ k.T without an explicit transpose.
            s = lax.dot_general(q, k, (((1,), (1,)), ((), ())),
                                preferred_element_type=jnp.float32)     # (T, T)
            scores.append(jnp.where(causal, s, NEG_INF))

    # ---- batched softmax over all B*H tiles stacked along sublanes ----
    s_all = jnp.concatenate(scores, axis=0)                   # (B*H*T, T) f32
    s_all = s_all - jnp.max(s_all, axis=-1, keepdims=True)
    e_all = jnp.exp(s_all)
    p_all = e_all * pl.reciprocal(jnp.sum(e_all, axis=-1, keepdims=True),
                                  approx=True)                # (B*H*T, T)

    # ---- pass 2: context + folded output projection, register accumulation ----
    attn_rows = []
    for b in range(B):
        acc = None
        for hh in range(H):
            idx = b * H + hh
            p = p_all[idx * T:(idx + 1) * T, :].astype(bf16)  # (T, T)
            ctx = jnp.dot(p, vals[idx],
                          preferred_element_type=jnp.float32)  # (T, D) f32
            contrib = jnp.dot(ctx.astype(bf16), wproj_ref[hh],
                              preferred_element_type=jnp.float32)  # (T, C)
            acc = contrib if acc is None else acc + contrib
        attn_rows.append(acc)
    x = x + jnp.concatenate(attn_rows, axis=0) + bproj_ref[...]   # residual 1

    # ---- LN2 + MLP (NewGELU tanh approximation), residual 2 ----
    h2 = _layernorm(x, ln2_w_ref[...], ln2_b_ref[...])
    f = jnp.dot(h2.astype(bf16), wfc_ref[...],
                preferred_element_type=jnp.float32) + bfc_ref[...]      # (BT, 4C)
    f = 0.5 * f * (1.0 + jnp.tanh(GELU_K * (f + 0.044715 * (f * f * f))))
    mlp = jnp.dot(f.astype(bf16), wfp_ref[...],
                  preferred_element_type=jnp.float32) + bfp_ref[...]    # (BT, C)

    o_ref[...] = x + mlp


def _vmem_spec():
    # Full-array, memory_space-only spec: no grid -> no pipelining, no
    # double-buffered prologue DMAs for the tiny operands.
    return pl.BlockSpec(memory_space=pltpu.MemorySpace.VMEM)


@jax.jit
def block_forward(x, params):
    (ln1_w, ln1_b, wqkv, bqkv, wproj, bproj,
     ln2_w, ln2_b, wfc, bfc, wfp, bfp) = params

    # Parameter preprocessing (free at deploy time):
    #  - fold the 1/sqrt(D) attention scale into the Q slice of the QKV proj,
    #  - permute QKV columns to head-major [q_h | k_h | v_h] blocks,
    #  - cast weight matrices to bf16 (f32 accumulation in the kernel),
    #  - reshape W_proj to (H, D, C) so the kernel indexes a leading axis,
    #  - reshape 1-D params to (1, N) lane rows.
    scale = 1.0 / math.sqrt(D)
    wqkv_s = wqkv.at[:, :C].multiply(scale)
    bqkv_s = bqkv.at[:C].multiply(scale)

    perm = np.concatenate(
        [np.concatenate([np.arange(h * D, (h + 1) * D),
                         C + np.arange(h * D, (h + 1) * D),
                         2 * C + np.arange(h * D, (h + 1) * D)])
         for h in range(H)])
    wqkv_hm = jnp.take(wqkv_s, perm, axis=1)
    bqkv_hm = jnp.take(bqkv_s, perm, axis=0)

    bf16 = jnp.bfloat16
    prepared = (
        ln1_w.reshape(1, C), ln1_b.reshape(1, C),
        wqkv_hm.astype(bf16), bqkv_hm.reshape(1, 3 * C),
        wproj.astype(bf16).reshape(H, D, C), bproj.reshape(1, C),
        ln2_w.reshape(1, C), ln2_b.reshape(1, C),
        wfc.astype(bf16), bfc.reshape(1, 4 * C),
        wfp.astype(bf16), bfp.reshape(1, C),
    )

    x2d = x.reshape(BT, C)

    out2d = pl.pallas_call(
        block_kernel,
        out_shape=jax.ShapeDtypeStruct((BT, C), jnp.float32),
        in_specs=[_vmem_spec() for _ in range(1 + len(prepared))],
        out_specs=_vmem_spec(),
    )(x2d, *prepared)
    return out2d.reshape(B, T, C)


# ---------------- pure-JAX f32 reference for verification ----------------
def block_reference(x, params):
    (ln1_w, ln1_b, wqkv, bqkv, wproj, bproj,
     ln2_w, ln2_b, wfc, bfc, wfp, bfp) = params

    def ln(v, g, b):
        mu = jnp.mean(v, axis=-1, keepdims=True)
        var = jnp.mean((v - mu) ** 2, axis=-1, keepdims=True)
        return (v - mu) / jnp.sqrt(var + LN_EPS) * g + b

    h = ln(x, ln1_w, ln1_b)
    qkv = h @ wqkv + bqkv
    q, k, v = jnp.split(qkv, 3, axis=-1)
    q = q.reshape(B, T, H, D).transpose(0, 2, 1, 3)
    k = k.reshape(B, T, H, D).transpose(0, 2, 1, 3)
    v = v.reshape(B, T, H, D).transpose(0, 2, 1, 3)
    att = jnp.einsum('bhtd,bhsd->bhts', q, k) / math.sqrt(D)
    mask = jnp.tril(jnp.ones((T, T), bool))[None, None]
    att = jnp.where(mask, att, -jnp.inf)
    att = jax.nn.softmax(att, axis=-1)
    y = jnp.einsum('bhts,bhsd->bhtd', att, v)
    y = y.transpose(0, 2, 1, 3).reshape(B, T, C)
    x = x + (y @ wproj + bproj)
    h2 = ln(x, ln2_w, ln2_b)
    f = h2 @ wfc + bfc
    f = 0.5 * f * (1.0 + jnp.tanh(GELU_K * (f + 0.044715 * f ** 3)))
    return x + (f @ wfp + bfp)


if __name__ == "__main__":
    key = jax.random.PRNGKey(0)
    ks = jax.random.split(key, 8)

    x = jax.random.normal(ks[0], (B, T, C), jnp.float32)

    # Deterministic parameter init (shapes from the module's __init__;
    # linear weights stored as (in_features, out_features)).
    s = 0.02
    params = (
        jnp.ones((C,), jnp.float32),                                # ln_1.weight
        jnp.zeros((C,), jnp.float32),                               # ln_1.bias
        jax.random.normal(ks[1], (C, 3 * C), jnp.float32) * s,      # c_attn W
        jax.random.normal(ks[2], (3 * C,), jnp.float32) * s,        # c_attn b
        jax.random.normal(ks[3], (C, C), jnp.float32) * s,          # c_proj W
        jax.random.normal(ks[4], (C,), jnp.float32) * s,            # c_proj b
        jnp.ones((C,), jnp.float32),                                # ln_2.weight
        jnp.zeros((C,), jnp.float32),                               # ln_2.bias
        jax.random.normal(ks[5], (C, 4 * C), jnp.float32) * s,      # mlp.c_fc W
        jax.random.normal(ks[6], (4 * C,), jnp.float32) * s,        # mlp.c_fc b
        jax.random.normal(ks[7], (4 * C, C), jnp.float32) * s,      # mlp.c_proj W
        jnp.zeros((C,), jnp.float32),                               # mlp.c_proj b
    )

    out = jax.block_until_ready(block_forward(x, params))
    ref = jax.block_until_ready(block_reference(x, params))

    assert out.shape == (B, T, C)
    # Kernel uses bf16 MXU operands (f32 accumulation) and an approximate
    # softmax reciprocal; the f32 reference therefore differs at the ~1e-3
    # level, well inside this tolerance.
    assert jnp.allclose(out, ref, atol=1e-2, rtol=1e-2), \
        f"max err {jnp.max(jnp.abs(out - ref))}"
    print("KERNEL_OK")
</pallas_src>

<mosaic_0001>
module attributes {stable_mosaic.version = 11 : i64} {
  func.func @block_kernel(%arg0: memref<16x32xf32, #tpu.memory_space<vmem>>, %arg1: memref<1x32xf32, #tpu.memory_space<vmem>>, %arg2: memref<1x32xf32, #tpu.memory_space<vmem>>, %arg3: memref<32x96xbf16, #tpu.memory_space<vmem>>, %arg4: memref<1x96xf32, #tpu.memory_space<vmem>>, %arg5: memref<4x8x32xbf16, #tpu.memory_space<vmem>>, %arg6: memref<1x32xf32, #tpu.memory_space<vmem>>, %arg7: memref<1x32xf32, #tpu.memory_space<vmem>>, %arg8: memref<1x32xf32, #tpu.memory_space<vmem>>, %arg9: memref<32x128xbf16, #tpu.memory_space<vmem>>, %arg10: memref<1x128xf32, #tpu.memory_space<vmem>>, %arg11: memref<128x32xbf16, #tpu.memory_space<vmem>>, %arg12: memref<1x32xf32, #tpu.memory_space<vmem>>, %arg13: memref<16x32xf32, #tpu.memory_space<vmem>>) attributes {dimension_semantics = [], scalar_prefetch = 0 : i64, scratch_operands = 0 : i64, tpu.core_type = #tpu.core_type<tc>} {
    %c0 = arith.constant 0 : index
    %c0_0 = arith.constant 0 : index
    %0 = vector.load %arg0[%c0, %c0_0] : memref<16x32xf32, #tpu.memory_space<vmem>>, vector<16x32xf32>
    %c0_1 = arith.constant 0 : index
    %c0_2 = arith.constant 0 : index
    %1 = vector.load %arg1[%c0_1, %c0_2] : memref<1x32xf32, #tpu.memory_space<vmem>>, vector<1x32xf32>
    %c0_3 = arith.constant 0 : index
    %c0_4 = arith.constant 0 : index
    %2 = vector.load %arg2[%c0_3, %c0_4] : memref<1x32xf32, #tpu.memory_space<vmem>>, vector<1x32xf32>
    %cst = arith.constant dense<0.000000e+00> : vector<16xf32>
    %3 = vector.multi_reduction <add>, %0, %cst [1] : vector<16x32xf32> to vector<16xf32>
    %4 = vector.shape_cast %3 : vector<16xf32> to vector<16x1xf32>
    %cst_5 = arith.constant 3.200000e+01 : f32
    %5 = vector.broadcast %cst_5 : f32 to vector<16x1xf32>
    %6 = arith.divf %4, %5 : vector<16x1xf32>
    %7 = vector.broadcast %6 : vector<16x1xf32> to vector<16x32xf32>
    %8 = arith.subf %0, %7 : vector<16x32xf32>
    %9 = arith.mulf %8, %8 : vector<16x32xf32>
    %cst_6 = arith.constant dense<0.000000e+00> : vector<16xf32>
    %10 = vector.multi_reduction <add>, %9, %cst_6 [1] : vector<16x32xf32> to vector<16xf32>
    %11 = vector.shape_cast %10 : vector<16xf32> to vector<16x1xf32>
    %cst_7 = arith.constant 3.200000e+01 : f32
    %12 = vector.broadcast %cst_7 : f32 to vector<16x1xf32>
    %13 = arith.divf %11, %12 : vector<16x1xf32>
    %14 = vector.broadcast %6 : vector<16x1xf32> to vector<16x32xf32>
    %15 = arith.subf %0, %14 : vector<16x32xf32>
    %cst_8 = arith.constant 9.99999974E-6 : f32
    %16 = vector.broadcast %cst_8 : f32 to vector<16x1xf32>
    %17 = arith.addf %13, %16 : vector<16x1xf32>
    %18 = math.rsqrt %17 : vector<16x1xf32>
    %19 = vector.broadcast %18 : vector<16x1xf32> to vector<16x32xf32>
    %20 = arith.mulf %15, %19 : vector<16x32xf32>
    %21 = vector.broadcast %1 : vector<1x32xf32> to vector<16x32xf32>
    %22 = arith.mulf %20, %21 : vector<16x32xf32>
    %23 = vector.broadcast %2 : vector<1x32xf32> to vector<16x32xf32>
    %24 = arith.addf %22, %23 : vector<16x32xf32>
    %25 = arith.truncf %24 : vector<16x32xf32> to vector<16x32xbf16>
    %c0_9 = arith.constant 0 : index
    %c0_10 = arith.constant 0 : index
    %26 = vector.load %arg3[%c0_9, %c0_10] : memref<32x96xbf16, #tpu.memory_space<vmem>>, vector<32x96xbf16>
    %cst_11 = arith.constant dense<0.000000e+00> : vector<16x96xf32>
    %27 = tpu.matmul %25, %26, %cst_11 {dimension_numbers = #tpu.dot_dimension_numbers<[1], [0], [0], [1], [0, 0, 1, 1], [], []>} : vector<16x32xbf16>, vector<32x96xbf16>, vector<16x96xf32> -> vector<16x96xf32>
    %c0_12 = arith.constant 0 : index
    %c0_13 = arith.constant 0 : index
    %28 = vector.load %arg4[%c0_12, %c0_13] : memref<1x96xf32, #tpu.memory_space<vmem>>, vector<1x96xf32>
    %29 = vector.broadcast %28 : vector<1x96xf32> to vector<16x96xf32>
    %30 = arith.addf %27, %29 : vector<16x96xf32>
    %31 = tpu.iota {dimensions = array<i32: 0>} : vector<8x8xi32>
    %32 = tpu.iota {dimensions = array<i32: 1>} : vector<8x8xi32>
    %33 = arith.cmpi sle, %32, %31 : vector<8x8xi32>
    %34 = vector.extract_strided_slice %30 {offsets = [0, 0], sizes = [8, 96], strides = [1, 1]} : vector<16x96xf32> to vector<8x96xf32>
    %35 = arith.truncf %34 : vector<8x96xf32> to vector<8x96xbf16>
    %36 = vector.extract_strided_slice %35 {offsets = [0, 0], sizes = [8, 8], strides = [1, 1]} : vector<8x96xbf16> to vector<8x8xbf16>
    %37 = vector.extract_strided_slice %35 {offsets = [0, 8], sizes = [8, 8], strides = [1, 1]} : vector<8x96xbf16> to vector<8x8xbf16>
    %38 = vector.extract_strided_slice %35 {offsets = [0, 16], sizes = [8, 8], strides = [1, 1]} : vector<8x96xbf16> to vector<8x8xbf16>
    %cst_14 = arith.constant dense<0.000000e+00> : vector<8x8xf32>
    %39 = tpu.matmul %36, %37, %cst_14 {dimension_numbers = #tpu.dot_dimension_numbers<[1], [1], [0], [0], [0, 0, 1, 0], [], []>} : vector<8x8xbf16>, vector<8x8xbf16>, vector<8x8xf32> -> vector<8x8xf32>
    %cst_15 = arith.constant -1.000000e+30 : f32
    %40 = vector.broadcast %cst_15 : f32 to vector<8x8xf32>
    %41 = arith.select %33, %39, %40 : vector<8x8xi1>, vector<8x8xf32>
    %42 = vector.extract_strided_slice %35 {offsets = [0, 24], sizes = [8, 8], strides = [1, 1]} : vector<8x96xbf16> to vector<8x8xbf16>
    %43 = vector.extract_strided_slice %35 {offsets = [0, 32], sizes = [8, 8], strides = [1, 1]} : vector<8x96xbf16> to vector<8x8xbf16>
    %44 = vector.extract_strided_slice %35 {offsets = [0, 40], sizes = [8, 8], strides = [1, 1]} : vector<8x96xbf16> to vector<8x8xbf16>
    %cst_16 = arith.constant dense<0.000000e+00> : vector<8x8xf32>
    %45 = tpu.matmul %42, %43, %cst_16 {dimension_numbers = #tpu.dot_dimension_numbers<[1], [1], [0], [0], [0, 0, 1, 0], [], []>} : vector<8x8xbf16>, vector<8x8xbf16>, vector<8x8xf32> -> vector<8x8xf32>
    %cst_17 = arith.constant -1.000000e+30 : f32
    %46 = vector.broadcast %cst_17 : f32 to vector<8x8xf32>
    %47 = arith.select %33, %45, %46 : vector<8x8xi1>, vector<8x8xf32>
    %48 = vector.extract_strided_slice %35 {offsets = [0, 48], sizes = [8, 8], strides = [1, 1]} : vector<8x96xbf16> to vector<8x8xbf16>
    %49 = vector.extract_strided_slice %35 {offsets = [0, 56], sizes = [8, 8], strides = [1, 1]} : vector<8x96xbf16> to vector<8x8xbf16>
    %50 = vector.extract_strided_slice %35 {offsets = [0, 64], sizes = [8, 8], strides = [1, 1]} : vector<8x96xbf16> to vector<8x8xbf16>
    %cst_18 = arith.constant dense<0.000000e+00> : vector<8x8xf32>
    %51 = tpu.matmul %48, %49, %cst_18 {dimension_numbers = #tpu.dot_dimension_numbers<[1], [1], [0], [0], [0, 0, 1, 0], [], []>} : vector<8x8xbf16>, vector<8x8xbf16>, vector<8x8xf32> -> vector<8x8xf32>
    %cst_19 = arith.constant -1.000000e+30 : f32
    %52 = vector.broadcast %cst_19 : f32 to vector<8x8xf32>
    %53 = arith.select %33, %51, %52 : vector<8x8xi1>, vector<8x8xf32>
    %54 = vector.extract_strided_slice %35 {offsets = [0, 72], sizes = [8, 8], strides = [1, 1]} : vector<8x96xbf16> to vector<8x8xbf16>
    %55 = vector.extract_strided_slice %35 {offsets = [0, 80], sizes = [8, 8], strides = [1, 1]} : vector<8x96xbf16> to vector<8x8xbf16>
    %56 = vector.extract_strided_slice %35 {offsets = [0, 88], sizes = [8, 8], strides = [1, 1]} : vector<8x96xbf16> to vector<8x8xbf16>
    %cst_20 = arith.constant dense<0.000000e+00> : vector<8x8xf32>
    %57 = tpu.matmul %54, %55, %cst_20 {dimension_numbers = #tpu.dot_dimension_numbers<[1], [1], [0], [0], [0, 0, 1, 0], [], []>} : vector<8x8xbf16>, vector<8x8xbf16>, vector<8x8xf32> -> vector<8x8xf32>
    %cst_21 = arith.constant -1.000000e+30 : f32
    %58 = vector.broadcast %cst_21 : f32 to vector<8x8xf32>
    %59 = arith.select %33, %57, %58 : vector<8x8xi1>, vector<8x8xf32>
    %60 = vector.extract_strided_slice %30 {offsets = [8, 0], sizes = [8, 96], strides = [1, 1]} : vector<16x96xf32> to vector<8x96xf32>
    %61 = arith.truncf %60 : vector<8x96xf32> to vector<8x96xbf16>
    %62 = vector.extract_strided_slice %61 {offsets = [0, 0], sizes = [8, 8], strides = [1, 1]} : vector<8x96xbf16> to vector<8x8xbf16>
    %63 = vector.extract_strided_slice %61 {offsets = [0, 8], sizes = [8, 8], strides = [1, 1]} : vector<8x96xbf16> to vector<8x8xbf16>
    %64 = vector.extract_strided_slice %61 {offsets = [0, 16], sizes = [8, 8], strides = [1, 1]} : vector<8x96xbf16> to vector<8x8xbf16>
    %cst_22 = arith.constant dense<0.000000e+00> : vector<8x8xf32>
    %65 = tpu.matmul %62, %63, %cst_22 {dimension_numbers = #tpu.dot_dimension_numbers<[1], [1], [0], [0], [0, 0, 1, 0], [], []>} : vector<8x8xbf16>, vector<8x8xbf16>, vector<8x8xf32> -> vector<8x8xf32>
    %cst_23 = arith.constant -1.000000e+30 : f32
    %66 = vector.broadcast %cst_23 : f32 to vector<8x8xf32>
    %67 = arith.select %33, %65, %66 : vector<8x8xi1>, vector<8x8xf32>
    %68 = vector.extract_strided_slice %61 {offsets = [0, 24], sizes = [8, 8], strides = [1, 1]} : vector<8x96xbf16> to vector<8x8xbf16>
    %69 = vector.extract_strided_slice %61 {offsets = [0, 32], sizes = [8, 8], strides = [1, 1]} : vector<8x96xbf16> to vector<8x8xbf16>
    %70 = vector.extract_strided_slice %61 {offsets = [0, 40], sizes = [8, 8], strides = [1, 1]} : vector<8x96xbf16> to vector<8x8xbf16>
    %cst_24 = arith.constant dense<0.000000e+00> : vector<8x8xf32>
    %71 = tpu.matmul %68, %69, %cst_24 {dimension_numbers = #tpu.dot_dimension_numbers<[1], [1], [0], [0], [0, 0, 1, 0], [], []>} : vector<8x8xbf16>, vector<8x8xbf16>, vector<8x8xf32> -> vector<8x8xf32>
    %cst_25 = arith.constant -1.000000e+30 : f32
    %72 = vector.broadcast %cst_25 : f32 to vector<8x8xf32>
    %73 = arith.select %33, %71, %72 : vector<8x8xi1>, vector<8x8xf32>
    %74 = vector.extract_strided_slice %61 {offsets = [0, 48], sizes = [8, 8], strides = [1, 1]} : vector<8x96xbf16> to vector<8x8xbf16>
    %75 = vector.extract_strided_slice %61 {offsets = [0, 56], sizes = [8, 8], strides = [1, 1]} : vector<8x96xbf16> to vector<8x8xbf16>
    %76 = vector.extract_strided_slice %61 {offsets = [0, 64], sizes = [8, 8], strides = [1, 1]} : vector<8x96xbf16> to vector<8x8xbf16>
    %cst_26 = arith.constant dense<0.000000e+00> : vector<8x8xf32>
    %77 = tpu.matmul %74, %75, %cst_26 {dimension_numbers = #tpu.dot_dimension_numbers<[1], [1], [0], [0], [0, 0, 1, 0], [], []>} : vector<8x8xbf16>, vector<8x8xbf16>, vector<8x8xf32> -> vector<8x8xf32>
    %cst_27 = arith.constant -1.000000e+30 : f32
    %78 = vector.broadcast %cst_27 : f32 to vector<8x8xf32>
    %79 = arith.select %33, %77, %78 : vector<8x8xi1>, vector<8x8xf32>
    %80 = vector.extract_strided_slice %61 {offsets = [0, 72], sizes = [8, 8], strides = [1, 1]} : vector<8x96xbf16> to vector<8x8xbf16>
    %81 = vector.extract_strided_slice %61 {offsets = [0, 80], sizes = [8, 8], strides = [1, 1]} : vector<8x96xbf16> to vector<8x8xbf16>
    %82 = vector.extract_strided_slice %61 {offsets = [0, 88], sizes = [8, 8], strides = [1, 1]} : vector<8x96xbf16> to vector<8x8xbf16>
    %cst_28 = arith.constant dense<0.000000e+00> : vector<8x8xf32>
    %83 = tpu.matmul %80, %81, %cst_28 {dimension_numbers = #tpu.dot_dimension_numbers<[1], [1], [0], [0], [0, 0, 1, 0], [], []>} : vector<8x8xbf16>, vector<8x8xbf16>, vector<8x8xf32> -> vector<8x8xf32>
    %cst_29 = arith.constant -1.000000e+30 : f32
    %84 = vector.broadcast %cst_29 : f32 to vector<8x8xf32>
    %85 = arith.select %33, %83, %84 : vector<8x8xi1>, vector<8x8xf32>
    %86 = tpu.concatenate %41, %47, %53, %59, %67, %73, %79, %85 in 0 : vector<8x8xf32>, vector<8x8xf32>, vector<8x8xf32>, vector<8x8xf32>, vector<8x8xf32>, vector<8x8xf32>, vector<8x8xf32>, vector<8x8xf32> -> vector<64x8xf32>
    %cst_30 = arith.constant dense<0xFF800000> : vector<64xf32>
    %87 = vector.multi_reduction <maximumf>, %86, %cst_30 [1] : vector<64x8xf32> to vector<64xf32>
    %88 = vector.shape_cast %87 : vector<64xf32> to vector<64x1xf32>
    %89 = vector.broadcast %88 : vector<64x1xf32> to vector<64x8xf32>
    %90 = arith.subf %86, %89 : vector<64x8xf32>
    %91 = math.exp %90 : vector<64x8xf32>
    %cst_31 = arith.constant dense<0.000000e+00> : vector<64xf32>
    %92 = vector.multi_reduction <add>, %91, %cst_31 [1] : vector<64x8xf32> to vector<64xf32>
    %93 = vector.shape_cast %92 : vector<64xf32> to vector<64x1xf32>
    %94 = tpu.reciprocal %93 {approx = true} : vector<64x1xf32> -> vector<64x1xf32>
    %95 = vector.broadcast %94 : vector<64x1xf32> to vector<64x8xf32>
    %96 = arith.mulf %91, %95 : vector<64x8xf32>
    %97 = vector.extract_strided_slice %96 {offsets = [0, 0], sizes = [8, 8], strides = [1, 1]} : vector<64x8xf32> to vector<8x8xf32>
    %98 = arith.truncf %97 : vector<8x8xf32> to vector<8x8xbf16>
    %cst_32 = arith.constant dense<0.000000e+00> : vector<8x8xf32>
    %99 = tpu.matmul %98, %38, %cst_32 {dimension_numbers = #tpu.dot_dimension_numbers<[1], [0], [0], [1], [0, 0, 1, 1], [], []>} : vector<8x8xbf16>, vector<8x8xbf16>, vector<8x8xf32> -> vector<8x8xf32>
    %100 = arith.truncf %99 : vector<8x8xf32> to vector<8x8xbf16>
    %c0_33 = arith.constant 0 : index
    %c0_34 = arith.constant 0 : index
    %c0_35 = arith.constant 0 : index
    %101 = vector.load %arg5[%c0_33, %c0_34, %c0_35] : memref<4x8x32xbf16, #tpu.memory_space<vmem>>, vector<1x8x32xbf16>
    %102 = vector.shape_cast %101 : vector<1x8x32xbf16> to vector<8x32xbf16>
    %cst_36 = arith.constant dense<0.000000e+00> : vector<8x32xf32>
    %103 = tpu.matmul %100, %102, %cst_36 {dimension_numbers = #tpu.dot_dimension_numbers<[1], [0], [0], [1], [0, 0, 1, 1], [], []>} : vector<8x8xbf16>, vector<8x32xbf16>, vector<8x32xf32> -> vector<8x32xf32>
    %104 = vector.extract_strided_slice %96 {offsets = [8, 0], sizes = [8, 8], strides = [1, 1]} : vector<64x8xf32> to vector<8x8xf32>
    %105 = arith.truncf %104 : vector<8x8xf32> to vector<8x8xbf16>
    %cst_37 = arith.constant dense<0.000000e+00> : vector<8x8xf32>
    %106 = tpu.matmul %105, %44, %cst_37 {dimension_numbers = #tpu.dot_dimension_numbers<[1], [0], [0], [1], [0, 0, 1, 1], [], []>} : vector<8x8xbf16>, vector<8x8xbf16>, vector<8x8xf32> -> vector<8x8xf32>
    %107 = arith.truncf %106 : vector<8x8xf32> to vector<8x8xbf16>
    %c1 = arith.constant 1 : index
    %c0_38 = arith.constant 0 : index
    %c0_39 = arith.constant 0 : index
    %108 = vector.load %arg5[%c1, %c0_38, %c0_39] : memref<4x8x32xbf16, #tpu.memory_space<vmem>>, vector<1x8x32xbf16>
    %109 = vector.shape_cast %108 : vector<1x8x32xbf16> to vector<8x32xbf16>
    %cst_40 = arith.constant dense<0.000000e+00> : vector<8x32xf32>
    %110 = tpu.matmul %107, %109, %cst_40 {dimension_numbers = #tpu.dot_dimension_numbers<[1], [0], [0], [1], [0, 0, 1, 1], [], []>} : vector<8x8xbf16>, vector<8x32xbf16>, vector<8x32xf32> -> vector<8x32xf32>
    %111 = arith.addf %103, %110 : vector<8x32xf32>
    %112 = vector.extract_strided_slice %96 {offsets = [16, 0], sizes = [8, 8], strides = [1, 1]} : vector<64x8xf32> to vector<8x8xf32>
    %113 = arith.truncf %112 : vector<8x8xf32> to vector<8x8xbf16>
    %cst_41 = arith.constant dense<0.000000e+00> : vector<8x8xf32>
    %114 = tpu.matmul %113, %50, %cst_41 {dimension_numbers = #tpu.dot_dimension_numbers<[1], [0], [0], [1], [0, 0, 1, 1], [], []>} : vector<8x8xbf16>, vector<8x8xbf16>, vector<8x8xf32> -> vector<8x8xf32>
    %115 = arith.truncf %114 : vector<8x8xf32> to vector<8x8xbf16>
    %c2 = arith.constant 2 : index
    %c0_42 = arith.constant 0 : index
    %c0_43 = arith.constant 0 : index
    %116 = vector.load %arg5[%c2, %c0_42, %c0_43] : memref<4x8x32xbf16, #tpu.memory_space<vmem>>, vector<1x8x32xbf16>
    %117 = vector.shape_cast %116 : vector<1x8x32xbf16> to vector<8x32xbf16>
    %cst_44 = arith.constant dense<0.000000e+00> : vector<8x32xf32>
    %118 = tpu.matmul %115, %117, %cst_44 {dimension_numbers = #tpu.dot_dimension_numbers<[1], [0], [0], [1], [0, 0, 1, 1], [], []>} : vector<8x8xbf16>, vector<8x32xbf16>, vector<8x32xf32> -> vector<8x32xf32>
    %119 = arith.addf %111, %118 : vector<8x32xf32>
    %120 = vector.extract_strided_slice %96 {offsets = [24, 0], sizes = [8, 8], strides = [1, 1]} : vector<64x8xf32> to vector<8x8xf32>
    %121 = arith.truncf %120 : vector<8x8xf32> to vector<8x8xbf16>
    %cst_45 = arith.constant dense<0.000000e+00> : vector<8x8xf32>
    %122 = tpu.matmul %121, %56, %cst_45 {dimension_numbers = #tpu.dot_dimension_numbers<[1], [0], [0], [1], [0, 0, 1, 1], [], []>} : vector<8x8xbf16>, vector<8x8xbf16>, vector<8x8xf32> -> vector<8x8xf32>
    %123 = arith.truncf %122 : vector<8x8xf32> to vector<8x8xbf16>
    %c3 = arith.constant 3 : index
    %c0_46 = arith.constant 0 : index
    %c0_47 = arith.constant 0 : index
    %124 = vector.load %arg5[%c3, %c0_46, %c0_47] : memref<4x8x32xbf16, #tpu.memory_space<vmem>>, vector<1x8x32xbf16>
    %125 = vector.shape_cast %124 : vector<1x8x32xbf16> to vector<8x32xbf16>
    %cst_48 = arith.constant dense<0.000000e+00> : vector<8x32xf32>
    %126 = tpu.matmul %123, %125, %cst_48 {dimension_numbers = #tpu.dot_dimension_numbers<[1], [0], [0], [1], [0, 0, 1, 1], [], []>} : vector<8x8xbf16>, vector<8x32xbf16>, vector<8x32xf32> -> vector<8x32xf32>
    %127 = arith.addf %119, %126 : vector<8x32xf32>
    %128 = vector.extract_strided_slice %96 {offsets = [32, 0], sizes = [8, 8], strides = [1, 1]} : vector<64x8xf32> to vector<8x8xf32>
    %129 = arith.truncf %128 : vector<8x8xf32> to vector<8x8xbf16>
    %cst_49 = arith.constant dense<0.000000e+00> : vector<8x8xf32>
    %130 = tpu.matmul %129, %64, %cst_49 {dimension_numbers = #tpu.dot_dimension_numbers<[1], [0], [0], [1], [0, 0, 1, 1], [], []>} : vector<8x8xbf16>, vector<8x8xbf16>, vector<8x8xf32> -> vector<8x8xf32>
    %131 = arith.truncf %130 : vector<8x8xf32> to vector<8x8xbf16>
    %c0_50 = arith.constant 0 : index
    %c0_51 = arith.constant 0 : index
    %c0_52 = arith.constant 0 : index
    %132 = vector.load %arg5[%c0_50, %c0_51, %c0_52] : memref<4x8x32xbf16, #tpu.memory_space<vmem>>, vector<1x8x32xbf16>
    %133 = vector.shape_cast %132 : vector<1x8x32xbf16> to vector<8x32xbf16>
    %cst_53 = arith.constant dense<0.000000e+00> : vector<8x32xf32>
    %134 = tpu.matmul %131, %133, %cst_53 {dimension_numbers = #tpu.dot_dimension_numbers<[1], [0], [0], [1], [0, 0, 1, 1], [], []>} : vector<8x8xbf16>, vector<8x32xbf16>, vector<8x32xf32> -> vector<8x32xf32>
    %135 = vector.extract_strided_slice %96 {offsets = [40, 0], sizes = [8, 8], strides = [1, 1]} : vector<64x8xf32> to vector<8x8xf32>
    %136 = arith.truncf %135 : vector<8x8xf32> to vector<8x8xbf16>
    %cst_54 = arith.constant dense<0.000000e+00> : vector<8x8xf32>
    %137 = tpu.matmul %136, %70, %cst_54 {dimension_numbers = #tpu.dot_dimension_numbers<[1], [0], [0], [1], [0, 0, 1, 1], [], []>} : vector<8x8xbf16>, vector<8x8xbf16>, vector<8x8xf32> -> vector<8x8xf32>
    %138 = arith.truncf %137 : vector<8x8xf32> to vector<8x8xbf16>
    %c1_55 = arith.constant 1 : index
    %c0_56 = arith.constant 0 : index
    %c0_57 = arith.constant 0 : index
    %139 = vector.load %arg5[%c1_55, %c0_56, %c0_57] : memref<4x8x32xbf16, #tpu.memory_space<vmem>>, vector<1x8x32xbf16>
    %140 = vector.shape_cast %139 : vector<1x8x32xbf16> to vector<8x32xbf16>
    %cst_58 = arith.constant dense<0.000000e+00> : vector<8x32xf32>
    %141 = tpu.matmul %138, %140, %cst_58 {dimension_numbers = #tpu.dot_dimension_numbers<[1], [0], [0], [1], [0, 0, 1, 1], [], []>} : vector<8x8xbf16>, vector<8x32xbf16>, vector<8x32xf32> -> vector<8x32xf32>
    %142 = arith.addf %134, %141 : vector<8x32xf32>
    %143 = vector.extract_strided_slice %96 {offsets = [48, 0], sizes = [8, 8], strides = [1, 1]} : vector<64x8xf32> to vector<8x8xf32>
    %144 = arith.truncf %143 : vector<8x8xf32> to vector<8x8xbf16>
    %cst_59 = arith.constant dense<0.000000e+00> : vector<8x8xf32>
    %145 = tpu.matmul %144, %76, %cst_59 {dimension_numbers = #tpu.dot_dimension_numbers<[1], [0], [0], [1], [0, 0, 1, 1], [], []>} : vector<8x8xbf16>, vector<8x8xbf16>, vector<8x8xf32> -> vector<8x8xf32>
    %146 = arith.truncf %145 : vector<8x8xf32> to vector<8x8xbf16>
    %c2_60 = arith.constant 2 : index
    %c0_61 = arith.constant 0 : index
    %c0_62 = arith.constant 0 : index
    %147 = vector.load %arg5[%c2_60, %c0_61, %c0_62] : memref<4x8x32xbf16, #tpu.memory_space<vmem>>, vector<1x8x32xbf16>
    %148 = vector.shape_cast %147 : vector<1x8x32xbf16> to vector<8x32xbf16>
    %cst_63 = arith.constant dense<0.000000e+00> : vector<8x32xf32>
    %149 = tpu.matmul %146, %148, %cst_63 {dimension_numbers = #tpu.dot_dimension_numbers<[1], [0], [0], [1], [0, 0, 1, 1], [], []>} : vector<8x8xbf16>, vector<8x32xbf16>, vector<8x32xf32> -> vector<8x32xf32>
    %150 = arith.addf %142, %149 : vector<8x32xf32>
    %151 = vector.extract_strided_slice %96 {offsets = [56, 0], sizes = [8, 8], strides = [1, 1]} : vector<64x8xf32> to vector<8x8xf32>
    %152 = arith.truncf %151 : vector<8x8xf32> to vector<8x8xbf16>
    %cst_64 = arith.constant dense<0.000000e+00> : vector<8x8xf32>
    %153 = tpu.matmul %152, %82, %cst_64 {dimension_numbers = #tpu.dot_dimension_numbers<[1], [0], [0], [1], [0, 0, 1, 1], [], []>} : vector<8x8xbf16>, vector<8x8xbf16>, vector<8x8xf32> -> vector<8x8xf32>
    %154 = arith.truncf %153 : vector<8x8xf32> to vector<8x8xbf16>
    %c3_65 = arith.constant 3 : index
    %c0_66 = arith.constant 0 : index
    %c0_67 = arith.constant 0 : index
    %155 = vector.load %arg5[%c3_65, %c0_66, %c0_67] : memref<4x8x32xbf16, #tpu.memory_space<vmem>>, vector<1x8x32xbf16>
    %156 = vector.shape_cast %155 : vector<1x8x32xbf16> to vector<8x32xbf16>
    %cst_68 = arith.constant dense<0.000000e+00> : vector<8x32xf32>
    %157 = tpu.matmul %154, %156, %cst_68 {dimension_numbers = #tpu.dot_dimension_numbers<[1], [0], [0], [1], [0, 0, 1, 1], [], []>} : vector<8x8xbf16>, vector<8x32xbf16>, vector<8x32xf32> -> vector<8x32xf32>
    %158 = arith.addf %150, %157 : vector<8x32xf32>
    %159 = tpu.concatenate %127, %158 in 0 : vector<8x32xf32>, vector<8x32xf32> -> vector<16x32xf32>
    %160 = arith.addf %0, %159 : vector<16x32xf32>
    %c0_69 = arith.constant 0 : index
    %c0_70 = arith.constant 0 : index
    %161 = vector.load %arg6[%c0_69, %c0_70] : memref<1x32xf32, #tpu.memory_space<vmem>>, vector<1x32xf32>
    %162 = vector.broadcast %161 : vector<1x32xf32> to vector<16x32xf32>
    %163 = arith.addf %160, %162 : vector<16x32xf32>
    %c0_71 = arith.constant 0 : index
    %c0_72 = arith.constant 0 : index
    %164 = vector.load %arg7[%c0_71, %c0_72] : memref<1x32xf32, #tpu.memory_space<vmem>>, vector<1x32xf32>
    %c0_73 = arith.constant 0 : index
    %c0_74 = arith.constant 0 : index
    %165 = vector.load %arg8[%c0_73, %c0_74] : memref<1x32xf32, #tpu.memory_space<vmem>>, vector<1x32xf32>
    %cst_75 = arith.constant dense<0.000000e+00> : vector<16xf32>
    %166 = vector.multi_reduction <add>, %163, %cst_75 [1] : vector<16x32xf32> to vector<16xf32>
    %167 = vector.shape_cast %166 : vector<16xf32> to vector<16x1xf32>
    %cst_76 = arith.constant 3.200000e+01 : f32
    %168 = vector.broadcast %cst_76 : f32 to vector<16x1xf32>
    %169 = arith.divf %167, %168 : vector<16x1xf32>
    %170 = vector.broadcast %169 : vector<16x1xf32> to vector<16x32xf32>
    %171 = arith.subf %163, %170 : vector<16x32xf32>
    %172 = arith.mulf %171, %171 : vector<16x32xf32>
    %cst_77 = arith.constant dense<0.000000e+00> : vector<16xf32>
    %173 = vector.multi_reduction <add>, %172, %cst_77 [1] : vector<16x32xf32> to vector<16xf32>
    %174 = vector.shape_cast %173 : vector<16xf32> to vector<16x1xf32>
    %cst_78 = arith.constant 3.200000e+01 : f32
    %175 = vector.broadcast %cst_78 : f32 to vector<16x1xf32>
    %176 = arith.divf %174, %175 : vector<16x1xf32>
    %177 = vector.broadcast %169 : vector<16x1xf32> to vector<16x32xf32>
    %178 = arith.subf %163, %177 : vector<16x32xf32>
    %cst_79 = arith.constant 9.99999974E-6 : f32
    %179 = vector.broadcast %cst_79 : f32 to vector<16x1xf32>
    %180 = arith.addf %176, %179 : vector<16x1xf32>
    %181 = math.rsqrt %180 : vector<16x1xf32>
    %182 = vector.broadcast %181 : vector<16x1xf32> to vector<16x32xf32>
    %183 = arith.mulf %178, %182 : vector<16x32xf32>
    %184 = vector.broadcast %164 : vector<1x32xf32> to vector<16x32xf32>
    %185 = arith.mulf %183, %184 : vector<16x32xf32>
    %186 = vector.broadcast %165 : vector<1x32xf32> to vector<16x32xf32>
    %187 = arith.addf %185, %186 : vector<16x32xf32>
    %188 = arith.truncf %187 : vector<16x32xf32> to vector<16x32xbf16>
    %c0_80 = arith.constant 0 : index
    %c0_81 = arith.constant 0 : index
    %189 = vector.load %arg9[%c0_80, %c0_81] : memref<32x128xbf16, #tpu.memory_space<vmem>>, vector<32x128xbf16>
    %cst_82 = arith.constant dense<0.000000e+00> : vector<16x128xf32>
    %190 = tpu.matmul %188, %189, %cst_82 {dimension_numbers = #tpu.dot_dimension_numbers<[1], [0], [0], [1], [0, 0, 1, 1], [], []>} : vector<16x32xbf16>, vector<32x128xbf16>, vector<16x128xf32> -> vector<16x128xf32>
    %c0_83 = arith.constant 0 : index
    %c0_84 = arith.constant 0 : index
    %191 = vector.load %arg10[%c0_83, %c0_84] : memref<1x128xf32, #tpu.memory_space<vmem>>, vector<1x128xf32>
    %192 = vector.broadcast %191 : vector<1x128xf32> to vector<16x128xf32>
    %193 = arith.addf %190, %192 : vector<16x128xf32>
    %cst_85 = arith.constant 5.000000e-01 : f32
    %194 = vector.broadcast %cst_85 : f32 to vector<16x128xf32>
    %195 = arith.mulf %194, %193 : vector<16x128xf32>
    %196 = arith.mulf %193, %193 : vector<16x128xf32>
    %197 = arith.mulf %196, %193 : vector<16x128xf32>
    %cst_86 = arith.constant 4.471500e-02 : f32
    %198 = vector.broadcast %cst_86 : f32 to vector<16x128xf32>
    %199 = arith.mulf %198, %197 : vector<16x128xf32>
    %200 = arith.addf %193, %199 : vector<16x128xf32>
    %cst_87 = arith.constant 0.797884583 : f32
    %201 = vector.broadcast %cst_87 : f32 to vector<16x128xf32>
    %202 = arith.mulf %201, %200 : vector<16x128xf32>
    %203 = math.tanh %202 : vector<16x128xf32>
    %cst_88 = arith.constant 1.000000e+00 : f32
    %204 = vector.broadcast %cst_88 : f32 to vector<16x128xf32>
    %205 = arith.addf %204, %203 : vector<16x128xf32>
    %206 = arith.mulf %195, %205 : vector<16x128xf32>
    %207 = arith.truncf %206 : vector<16x128xf32> to vector<16x128xbf16>
    %c0_89 = arith.constant 0 : index
    %c0_90 = arith.constant 0 : index
    %208 = vector.load %arg11[%c0_89, %c0_90] : memref<128x32xbf16, #tpu.memory_space<vmem>>, vector<128x32xbf16>
    %cst_91 = arith.constant dense<0.000000e+00> : vector<16x32xf32>
    %209 = tpu.matmul %207, %208, %cst_91 {dimension_numbers = #tpu.dot_dimension_numbers<[1], [0], [0], [1], [0, 0, 1, 1], [], []>} : vector<16x128xbf16>, vector<128x32xbf16>, vector<16x32xf32> -> vector<16x32xf32>
    %c0_92 = arith.constant 0 : index
    %c0_93 = arith.constant 0 : index
    %210 = vector.load %arg12[%c0_92, %c0_93] : memref<1x32xf32, #tpu.memory_space<vmem>>, vector<1x32xf32>
    %211 = vector.broadcast %210 : vector<1x32xf32> to vector<16x32xf32>
    %212 = arith.addf %209, %211 : vector<16x32xf32>
    %213 = arith.addf %163, %212 : vector<16x32xf32>
    %c0_94 = arith.constant 0 : index
    %c0_95 = arith.constant 0 : index
    %214 = vector.load %arg13[%c0_94, %c0_95] : memref<16x32xf32, #tpu.memory_space<vmem>>, vector<16x32xf32>
    tpu.vector_store %arg13[%c0_94, %c0_95], %213 {strides = array<i32>} : memref<16x32xf32, #tpu.memory_space<vmem>>, vector<16x32xf32>,
    return
  }
}

</mosaic_0001>

<bundles_post_ra>
// kernel: block_forward.1
= control target key start
LH: loop header
LB: loop body
LE: loop exit
PB: predicated region body
PF: predicated region fallthrough
CT: control target
= control target key end

     0   :  { %vm50_vm0 = vcmask 261120   ;;  %s2552_s0 = inlined_call_operand.vmem [shape: f32[16,32], index: 0, kind: input, shape index: {}]   ;;  %s2553_s1 = inlined_call_operand.vmem [shape: f32[1,32], index: 1, kind: input, shape index: {}]   ;;  %s2554_s2 = inlined_call_operand.vmem [shape: f32[1,32], index: 2, kind: input, shape index: {}]   ;;  %s2555_s3 = inlined_call_operand.vmem [shape: bf16[32,96], index: 3, kind: input, shape index: {}]   ;;  %s2556_s4 = inlined_call_operand.vmem [shape: f32[1,96], index: 4, kind: input, shape index: {}]   ;;  %s2557_s5 = inlined_call_operand.vmem [shape: bf16[4,8,32], index: 5, kind: input, shape index: {}]   ;;  %s2558_s6 = inlined_call_operand.vmem [shape: f32[1,32], index: 6, kind: input, shape index: {}]   ;;  %s2559_s7 = inlined_call_operand.vmem [shape: f32[1,32], index: 7, kind: input, shape index: {}]   ;;  %s2560_s8 = inlined_call_operand.vmem [shape: f32[1,32], index: 8, kind: input, shape index: {}]   ;;  %s2561_s9 = inlined_call_operand.vmem [shape: bf16[32,128], index: 9, kind: input, shape index: {}]   ;;  %s2562_s10 = inlined_call_operand.vmem [shape: f32[1,128], index: 10, kind: input, shape index: {}]   ;;  %s2563_s11 = inlined_call_operand.vmem [shape: bf16[128,32], index: 11, kind: input, shape index: {}]   ;;  %s2564_s12 = inlined_call_operand.vmem [shape: f32[1,32], index: 12, kind: input, shape index: {}]   ;;  %s2565_s13 = inlined_call_operand.hbm [shape: f32[16,32], index: 13, kind: output, shape index: {}]  }
   0x1   :  { %v2181_v0 = vld [vmem:[%s2552_s0] sm:$0xff]  ;;  %v2186_v1 = vld [vmem:[%s2552_s0 + $0x8] sm:$0xff] }
   0x2   :  { %v51_v2 = vsel %vm50_vm0, %v2181_v0, 0.0  ;;  %v54_v3 = vsel %vm50_vm0, %v2186_v1, 0.0 }
   0x3   :  { %52 = vadd.xlane.f32.xlu0 %v51_v2 }
   0x7   :  { %55 = vadd.xlane.f32.xlu0 %v54_v3 }
   0x8   :  { %18 = vsyncpa [#allocation3], 0  ;;  %v2014_v14 = vld [vmem:[%s2555_s3 + $0x8] sm:$0xff]   ;;  %v2092_v15 = vmov 0.0   ;;  %vm2093_vm1 = vmmov 0   ;;  %v2015_v16 = vld [vmem:[%s2555_s3] sm:$0xff]   ;;  %v162_v56 = vlaneseq }
   0x9   :  { %1818 = vmatprep.subr.bf16.mxu1 %v2092_v15  ;;  %1822 = vmatprep.mubr.msk.bf16.mxu1 %vm2093_vm1, %v2092_v15  ;;  %v1706_v25 = vld [vmem:[%s2553_s1] ss:$0 sm:$0xff]  ;;  %s2094_s1 = smov 96   ;;  %s2096_s20 = smov 104   ;;  %vm171_vm2 = vcmask 64512   ;;  %vm670_vm4 = vcmask 1043456  }
   0xa   :  { %1819 = vmatpush3.bf16.msra.mxu1 %v2014_v14  ;;  %1844 = vmatprep.subr.bf16.mxu0 %v2092_v15  ;;  %v1707_v29 = vld [vmem:[%s2554_s2] ss:$0 sm:$0xff]  ;;  %s2095_s2 = smov 120   ;;  %s2097_s21 = smov 80   ;;  %v163_v59 = vshrl.u32 %v162_v56, 7  ;;  %v165_v60 = vand.u32 127, %v162_v56 }
   0xb   :  { %1820 = vmatprep.subr.bf16.mxu1 %v2092_v15  ;;  %1846 = vmatprep.mubr.msk.bf16.mxu0 %vm2093_vm1, %v2092_v15  ;;  %v1708_v34 = vld [vmem:[%s2556_s4] ss:$0 sm:$0xff]  ;;  %s2098_s4 = smov 72   ;;  %s2099_s22 = smov 56  }
   0xc   :  { %s2100_s23 = smov 48   ;;  %vm2263_vm3 = vcmp.le.s32.totalorder %v165_v60, %v163_v59  ;;  %s2101_s24 = smov 88  }
   0xd   :  { %s2102_s25 = smov 112   ;;  %s2103_s26 = smov 40  }
   0xe   :  { %1821 = vmatpush3.bf16.msra.mxu1 %v2015_v16  ;;  %s2104_s27 = smov 64   ;;  %s2105_s17 = smov [#allocation2]  }
   0xf   :  { %1826 = vmatprep.subr.bf16.mxu1 %v2092_v15 }
  0x8c   :  { %v53_v4 = vpop.xlane.xlu0 %52 }
  0x8d   :  { %v58_v5 = vmul.f32 0.03125, %v53_v4 }
  0x8f   :  { %v60_v6 = vsub.f32 %v2181_v0, %v58_v5 }
  0x90   :  { %v56_v7 = vpop.xlane.xlu0 %55 }
  0x91   :  { %v59_v8 = vmul.f32 0.03125, %v56_v7  ;;  %v62_v9 = vmul.f32 %v60_v6, %v60_v6 }
  0x93   :  { %v61_v10 = vsub.f32 %v2186_v1, %v59_v8  ;;  %v64_v11 = vsel %vm50_vm0, %v62_v9, 0.0 }
  0x94   :  { %65 = vadd.xlane.f32.xlu1 %v64_v11 }
  0x95   :  { %v63_v12 = vmul.f32 %v61_v10, %v61_v10 }
  0x97   :  { %v67_v13 = vsel %vm50_vm0, %v63_v12, 0.0 }
  0x98   :  { %68 = vadd.xlane.f32.xlu1 %v67_v13 }
 0x11d   :  { %v66_v17 = vpop.xlane.xlu1 %65 }
 0x11e   :  { %v70_v18 = vmul.f32 0.03125, %v66_v17 }
 0x120   :  { %v72_v19 = vadd.f32 1e-05, %v70_v18 }
 0x121   :  { %v69_v20 = vpop.xlane.xlu1 %68 }
 0x122   :  { %2026 = vrsqrt.f32 %v72_v19  ;;  %v71_v21 = vmul.f32 0.03125, %v69_v20 }
 0x124   :  { %v73_v22 = vadd.f32 1e-05, %v71_v21 }
 0x126   :  { %2028 = vrsqrt.f32 %v73_v22 }
 0x12f   :  { %v2027_v23 = vpop.eup %2026 }
 0x130   :  { %v76_v24 = vmul.f32 %v2027_v23, %v60_v6 }
 0x132   :  { %v84_v28 = vmul.f32 %v1706_v25, %v76_v24 }
 0x133   :  { %v2029_v26 = vpop.eup %2028 }
 0x134   :  { %v77_v27 = vmul.f32 %v2029_v26, %v61_v10  ;;  %v92_v31 = vadd.f32 %v1707_v29, %v84_v28 }
 0x136   :  { %v85_v30 = vmul.f32 %v1706_v25, %v77_v27 }
 0x138   :  { %v93_v32 = vadd.f32 %v1707_v29, %v85_v30 }
 0x13a   :  { %v94_v33 = vpack.c.bf16 %v93_v32, %v92_v31 }
 0x13c   :  { %1823 = vmatmul.mubr.msk.bf16.vlgmr.msra.gmra.mxu1 %vm50_vm0, %v94_v33 }
 0x13d   :  { %1828 = vmatprep.mubr.msk.bf16.mxu1 %vm2093_vm1, %v2092_v15 }
 0x1fc   :  { %v155_v35 = vpop.f32.mrf.mxu1 }
 0x1fd   :  { %v156_v36 = vadd.f32 %v1708_v34, %v155_v35 }
 0x1fe   :  { %v1824_v37 = vpop.f32.mrf.mxu1 }
 0x1ff   :  { %v2222_v38 = vpack.c.bf16 %v156_v36, %v156_v36 }
 0x200   :  { %v158_v39 = vpop.f32.mrf.mxu1 }
 0x201   :  { %221 = vrot.lane.b32.xlu1 %v2222_v38, %s2094_s1  ;;  %169 = vrot.lane.b32.xlu0 %v2222_v38, %s2095_s2  ;;  %v159_v41 = vadd.f32 %v1708_v34, %v158_v39 }
 0x202   :  { %v1825_v40 = vpop.f32.mrf.mxu1 }
 0x203   :  { %v2235_v42 = vpack.c.bf16 %v159_v41, %v159_v41 }
 0x205   :  { %219 = vrot.lane.b32.xlu1 %v2222_v38, %s2096_s20  ;;  %270 = vrot.lane.b32.xlu0 %v2222_v38, %s2097_s21 }
 0x209   :  { %272 = vrot.lane.b32.xlu1 %v2222_v38, %s2098_s4  ;;  %321 = vrot.lane.b32.xlu0 %v2222_v38, %s2099_s22 }
 0x20d   :  { %323 = vrot.lane.b32.xlu1 %v2222_v38, %s2100_s23  ;;  %425 = vrot.lane.b32.xlu0 %v2235_v42, %s2094_s1 }
 0x273   :  { %v222_v43 = vpop.permute.xlu1 %221  ;;  %v170_v44 = vpop.permute.xlu0 %169 }
 0x274   :  { %v176_v45 = vsel %vm171_vm2, %v170_v44, 0  ;;  %v227_v49 = vsel %vm171_vm2, %v222_v43, 0 }
 0x275   :  { %1827 = vmatpush3.bf16.xpose.msra.mxu1 %v176_v45 }
 0x276   :  { %1832 = vmatprep.subr.bf16.mxu1 %v2092_v15 }
 0x277   :  { %v220_v46 = vpop.permute.xlu1 %219  ;;  %v271_v47 = vpop.permute.xlu0 %270 }
 0x27b   :  { %v273_v48 = vpop.permute.xlu1 %272  ;;  %v322_v50 = vpop.permute.xlu0 %321 }
 0x27c   :  { %1829 = vmatmul.mubr.msk.bf16.vlgmr.msra.gmra.mxu1 %vm171_vm2, %v2222_v38  ;;  %v278_v53 = vsel %vm171_vm2, %v273_v48, 0 }
 0x27d   :  { %1833 = vmatpush3.bf16.xpose.msra.mxu1 %v227_v49  ;;  %1834 = vmatprep.mubr.msk.bf16.mxu1 %vm2093_vm1, %v2092_v15 }
 0x27e   :  { %1838 = vmatprep.subr.bf16.mxu1 %v2092_v15 }
 0x27f   :  { %v324_v51 = vpop.permute.xlu1 %323  ;;  %v426_v54 = vpop.permute.xlu0 %425 }
 0x280   :  { %v329_v52 = vsel %vm171_vm2, %v324_v51, 0  ;;  %v431_v55 = vsel %vm171_vm2, %v426_v54, 0 }
 0x281   :  { %1845 = vmatpush3.bf16.xpose.msra.mxu0 %v329_v52 }
 0x282   :  { %1856 = vmatprep.subr.bf16.mxu0 %v2092_v15 }
 0x284   :  { %1835 = vmatmul.mubr.msk.bf16.vlgmr.msra.gmra.mxu1 %vm171_vm2, %v220_v46 }
 0x285   :  { %1839 = vmatpush3.bf16.xpose.msra.mxu1 %v278_v53  ;;  %1840 = vmatprep.mubr.msk.bf16.mxu1 %vm2093_vm1, %v2092_v15 }
 0x286   :  { %1850 = vmatprep.subr.bf16.mxu1 %v2092_v15 }
 0x288   :  { %1847 = vmatmul.mubr.msk.bf16.vlgmr.msra.gmra.mxu0 %vm171_vm2, %v322_v50 }
 0x289   :  { %1857 = vmatpush3.bf16.xpose.msra.mxu0 %v431_v55  ;;  %1858 = vmatprep.mubr.msk.bf16.mxu0 %vm2093_vm1, %v2092_v15 }
 0x28a   :  { %1868 = vmatprep.subr.bf16.mxu0 %v2092_v15 }
 0x28c   :  { %1841 = vmatmul.mubr.msk.bf16.vlgmr.msra.gmra.mxu1 %vm171_vm2, %v271_v47 }
 0x28d   :  { %1852 = vmatprep.mubr.msk.bf16.mxu1 %vm2093_vm1, %v2092_v15 }
 0x33c   :  { %v212_v57 = vpop.f32.mrf.mxu1 }
 0x33d   :  { %v218_v31 = vsel %vm2263_vm3, %v212_v57, -1e+30 }
 0x33e   :  { %v1830_v58 = vpop.f32.mrf.mxu1  ;;  %v576_v32 = vsel %vm171_vm2, %v218_v31, -inf }
 0x340   :  { %v215_v61 = vpop.f32.mrf.mxu1 }
 0x342   :  { %v1831_v62 = vpop.f32.mrf.mxu1 }
 0x344   :  { %v263_v2 = vpop.f32.mrf.mxu1 }
 0x345   :  { %v269_v3 = vsel %vm2263_vm3, %v263_v2, -1e+30 }
 0x346   :  { %v1836_v4 = vpop.f32.mrf.mxu1  ;;  %v579_v5 = vsel %vm171_vm2, %v269_v3, -inf }
 0x347   :  { %580 = vmax.xlane.f32.xlu1 %v579_v5 }
 0x348   :  { %v266_v6 = vpop.f32.mrf.mxu1  ;;  %v365_v7 = vpop.f32.mrf.mxu0 }
 0x349   :  { %v371_v33 = vsel %vm2263_vm3, %v365_v7, -1e+30 }
 0x34a   :  { %v1837_v8 = vpop.f32.mrf.mxu1  ;;  %v1848_v9 = vpop.f32.mrf.mxu0  ;;  %v585_v34 = vsel %vm171_vm2, %v371_v33, -inf }
 0x34c   :  { %v314_v10 = vpop.f32.mrf.mxu1  ;;  %v368_v11 = vpop.f32.mrf.mxu0 }
 0x34d   :  { %v320_v17 = vsel %vm2263_vm3, %v314_v10, -1e+30 }
 0x34e   :  { %v1842_v12 = vpop.f32.mrf.mxu1  ;;  %v1849_v13 = vpop.f32.mrf.mxu0  ;;  %v582_v18 = vsel %vm171_vm2, %v320_v17, -inf }
 0x350   :  { %v317_v14 = vpop.f32.mrf.mxu1 }
 0x352   :  { %v1843_v16 = vpop.f32.mrf.mxu1 }
 0x358   :  { %423 = vrot.lane.b32.xlu1 %v2235_v42, %s2096_s20 }
 0x35c   :  { %527 = vrot.lane.b32.xlu1 %v2235_v42, %s2100_s23 }
 0x360   :  { %717 = vrot.lane.b32.xlu1 %v2222_v38, %s2101_s24 }
 0x384   :  { %583 = vmax.xlane.f32.xlu1 %v582_v18 }
 0x395   :  { %476 = vrot.lane.b32.xlu1 %v2235_v42, %s2098_s4 }
 0x399   :  { %665 = vrot.lane.b32.xlu1 %v2222_v38, %s2102_s25 }
 0x3d0   :  { %v581_v19 = vpop.xlane.xlu1 %580 }
 0x3d1   :  { %v601_v20 = vsub.f32 %v269_v3, %v581_v19 }
 0x3d3   :  { %v610_v21 = vmul.f32 1.442695, %v601_v20 }
 0x3d4   :  { %v424_v22 = vpop.permute.xlu1 %423 }
 0x3d5   :  { %2030 = vpow2.f32 %v610_v21  ;;  %1859 = vmatmul.mubr.msk.bf16.vlgmr.msra.gmra.mxu0 %vm171_vm2, %v424_v22 }
 0x3d6   :  { %1870 = vmatprep.mubr.msk.bf16.mxu0 %vm2093_vm1, %v2092_v15 }
 0x3d8   :  { %v528_v23 = vpop.permute.xlu1 %527 }
 0x3d9   :  { %v533_v24 = vsel %vm171_vm2, %v528_v23, 0 }
 0x3da   :  { %1869 = vmatpush3.bf16.xpose.msra.mxu0 %v533_v24 }
 0x3db   :  { %1880 = vmatprep.subr.bf16.mxu0 %v2092_v15 }
 0x3dc   :  { %v718_v27 = vpop.permute.xlu1 %717 }
 0x3dd   :  { %v723_v40 = vsel %vm670_vm4, %v718_v27, 0 }
 0x3e2   :  { %v2031_v25 = vpop.eup %2030 }
 0x3e3   :  { %v627_v26 = vsel %vm171_vm2, %v2031_v25, 0.0 }
 0x3e4   :  { %628 = vadd.xlane.f32.xlu0 %v627_v26 }
 0x3fa   :  { %525 = vrot.lane.b32.xlu0 %v2235_v42, %s2099_s22 }
 0x40d   :  { %v584_v28 = vpop.xlane.xlu1 %583 }
 0x40e   :  { %v602_v29 = vsub.f32 %v320_v17, %v584_v28 }
 0x410   :  { %v612_v30 = vmul.f32 1.442695, %v602_v29 }
 0x411   :  { %v477_v61 = vpop.permute.xlu1 %476 }
 0x412   :  { %2032 = vpow2.f32 %v612_v30  ;;  %v482_v20 = vsel %vm171_vm2, %v477_v61, 0  ;;  %v1726_v61 = vld [vmem:[%s2557_s5 + $0x8] sm:$0xf] }
 0x415   :  { %v666_v62 = vpop.permute.xlu1 %665 }
 0x416   :  { %v672_v23 = vsel %vm670_vm4, %v666_v62, 0 }
 0x419   :  { %577 = vmax.xlane.f32.xlu0 %v576_v32 }
 0x41d   :  { %586 = vmax.xlane.f32.xlu0 %v585_v34 }
 0x41f   :  { %v2297_v35 = vpop.eup %2032 }
 0x420   :  { %v630_v36 = vsel %vm171_vm2, %v2297_v35, 0.0 }
 0x421   :  { %631 = vadd.xlane.f32.xlu1 %v630_v36 }
 0x432   :  { %960 = vrot.lane.b32.xlu1 %v2222_v38, %s2103_s26 }
 0x46d   :  { %v629_v37 = vpop.xlane.xlu0 %628 }
 0x46e   :  { %2034 = vrcp.f32 %v629_v37 }
 0x471   :  { %v526_v39 = vpop.permute.xlu0 %525 }
 0x472   :  { %1871 = vmatmul.mubr.msk.bf16.vlgmr.msra.gmra.mxu0 %vm171_vm2, %v526_v39 }
 0x473   :  { %1881 = vmatpush3.bf16.msra.mxu0 %v723_v40  ;;  %1882 = vmatprep.mubr.msk.bf16.mxu0 %vm2093_vm1, %v2092_v15  ;;  %v715_v40 = vld [vmem:[%s2557_s5] sm:$0xf] }
 0x474   :  { %1892 = vmatprep.subr.bf16.mxu0 %v2092_v15 }
 0x47b   :  { %v2035_v41 = vpop.eup %2034 }
 0x47c   :  { %v657_v43 = vmul.f32 %v2035_v41, %v2031_v25  ;;  %v1722_v25 = vld [vmem:[%s2557_s5 + $0x4] sm:$0xf]  ;;  %v2380_v41 = vsel %vm670_vm4, %v715_v40, 0 }
 0x47d   :  { %v2354_v27 = vsel %vm670_vm4, %v1722_v25, 0 }
 0x47e   :  { %v716_v44 = vpack.c.bf16 %v657_v43, %v657_v43 }
 0x480   :  { %1883 = vmatmul.mubr.msk.bf16.vlgmr.msra.gmra.mxu0 %vm171_vm2, %v716_v44 }
 0x481   :  { %1894 = vmatprep.mubr.msk.bf16.mxu0 %vm2093_vm1, %v2092_v15  ;;  %1893 = vmatpush3.bf16.msra.mxu0 %v2380_v41 }
 0x482   :  { %1904 = vmatprep.subr.bf16.mxu0 %v2092_v15 }
 0x495   :  { %v467_v45 = vpop.f32.mrf.mxu0 }
 0x496   :  { %v473_v46 = vsel %vm2263_vm3, %v467_v45, -1e+30 }
 0x497   :  { %v1860_v47 = vpop.f32.mrf.mxu0  ;;  %v591_v48 = vsel %vm171_vm2, %v473_v46, -inf }
 0x498   :  { %592 = vmax.xlane.f32.xlu1 %v591_v48 }
 0x499   :  { %v470_v49 = vpop.f32.mrf.mxu0 }
 0x49b   :  { %v1861_v50 = vpop.f32.mrf.mxu0 }
 0x4a2   :  { %v578_v51 = vpop.xlane.xlu0 %577 }
 0x4a3   :  { %v600_v52 = vsub.f32 %v218_v31, %v578_v51 }
 0x4a5   :  { %v608_v53 = vmul.f32 1.442695, %v600_v52 }
 0x4a6   :  { %v587_v56 = vpop.xlane.xlu0 %586 }
 0x4a7   :  { %2036 = vpow2.f32 %v608_v53  ;;  %v603_v57 = vsub.f32 %v371_v33, %v587_v56 }
 0x4a9   :  { %v614_v58 = vmul.f32 1.442695, %v603_v57 }
 0x4aa   :  { %v632_v2 = vpop.xlane.xlu1 %631 }
 0x4ab   :  { %2038 = vpow2.f32 %v614_v58 }
 0x4ae   :  { %v961_v3 = vpop.permute.xlu1 %960 }
 0x4af   :  { %v966_v36 = vsel %vm670_vm4, %v961_v3, 0  ;;  %v2400_v3 = vsel %vm670_vm4, %v1726_v61, 0 }
 0x4b4   :  { %v2037_v54 = vpop.eup %2036 }
 0x4b5   :  { %v624_v55 = vsel %vm171_vm2, %v2037_v54, 0.0 }
 0x4b6   :  { %625 = vadd.xlane.f32.xlu0 %v624_v55 }
 0x4b8   :  { %v2319_v59 = vpop.eup %2038 }
 0x4b9   :  { %v633_v60 = vsel %vm171_vm2, %v2319_v59, 0.0 }
 0x4cc   :  { %374 = vrot.lane.b32.xlu0 %v2235_v42, %s2095_s2 }
 0x4d0   :  { %474 = vrot.lane.b32.xlu0 %v2235_v42, %s2097_s21 }
 0x4ef   :  { %634 = vadd.xlane.f32.xlu0 %v633_v60 }
 0x505   :  { %861 = vrot.lane.b32.xlu0 %v2222_v38, %s2104_s27 }
 0x521   :  { %v593_v4 = vpop.xlane.xlu1 %592 }
 0x522   :  { %v605_v5 = vsub.f32 %v473_v46, %v593_v4 }
 0x524   :  { %v618_v6 = vmul.f32 1.442695, %v605_v5 }
 0x526   :  { %2040 = vpow2.f32 %v618_v6 }
 0x532   :  { %v2325_v7 = vpop.f32.mrf.mxu0 }
 0x533   :  { %v2327_v8 = vpop.eup %2040  ;;  %v575_v57 = vsel %vm2263_vm3, %v2325_v7, -1e+30 }
 0x534   :  { %v1872_v9 = vpop.f32.mrf.mxu0  ;;  %v639_v10 = vsel %vm171_vm2, %v2327_v8, 0.0  ;;  %v597_v60 = vsel %vm171_vm2, %v575_v57, -inf }
 0x535   :  { %640 = vadd.xlane.f32.xlu0 %v639_v10 }
 0x536   :  { %v572_v11 = vpop.f32.mrf.mxu0 }
 0x537   :  { %v1729_v11 = vld [vmem:[%s2557_s5 + $0xc] sm:$0xf] }
 0x538   :  { %v1873_v12 = vpop.f32.mrf.mxu0 }
 0x53f   :  { %v626_v38 = vpop.xlane.xlu0 %625 }
 0x540   :  { %v759_v13 = vpop.f32.mrf.mxu0  ;;  %2042 = vrcp.f32 %v626_v38 }
 0x541   :  { %v765_v28 = vpack.c.bf16 %v759_v13, %v759_v13  ;;  %2044 = vrcp.f32 %v632_v2  ;;  %v2413_v13 = vsel %vm670_vm4, %v1729_v11, 0 }
 0x542   :  { %v1884_v14 = vpop.f32.mrf.mxu0 }
 0x543   :  { %v375_v16 = vpop.permute.xlu0 %374 }
 0x544   :  { %v380_v17 = vsel %vm171_vm2, %v375_v16, 0  ;;  %v762_v18 = vpop.f32.mrf.mxu0 }
 0x545   :  { %1851 = vmatpush3.bf16.xpose.msra.mxu1 %v380_v17 }
 0x546   :  { %v1885_v19 = vpop.f32.mrf.mxu0  ;;  %1862 = vmatprep.subr.bf16.mxu1 %v2092_v15 }
 0x547   :  { %v475_v22 = vpop.permute.xlu0 %474 }
 0x54b   :  { %1109 = vrot.lane.b32.xlu0 %v2235_v42, %s2101_s24 }
 0x54c   :  { %1853 = vmatmul.mubr.msk.bf16.vlgmr.msra.gmra.mxu1 %vm171_vm2, %v2235_v42 }
 0x54d   :  { %1863 = vmatpush3.bf16.xpose.msra.mxu1 %v482_v20  ;;  %1864 = vmatprep.mubr.msk.bf16.mxu1 %vm2093_vm1, %v2092_v15  ;;  %v2043_v21 = vpop.eup %2042 }
 0x54e   :  { %1874 = vmatprep.subr.bf16.mxu1 %v2092_v15  ;;  %v656_v24 = vmul.f32 %v2043_v21, %v2037_v54  ;;  %v2045_v29 = vpop.eup %2044 }
 0x54f   :  { %1059 = vrot.lane.b32.xlu0 %v2235_v42, %s2102_s25  ;;  %v658_v31 = vmul.f32 %v2045_v29, %v2297_v35 }
 0x550   :  { %v664_v26 = vpack.c.bf16 %v656_v24, %v656_v24 }
 0x551   :  { %v860_v34 = vpack.c.bf16 %v658_v31, %v658_v31 }
 0x553   :  { %1339 = vrot.lane.b32.xlu0 %v2235_v42, %s2103_s26 }
 0x554   :  { %1865 = vmatmul.mubr.msk.bf16.vlgmr.msra.gmra.mxu1 %vm171_vm2, %v475_v22 }
 0x555   :  { %1875 = vmatpush3.bf16.msra.mxu1 %v672_v23  ;;  %1876 = vmatprep.mubr.msk.bf16.mxu1 %vm2093_vm1, %v2092_v15 }
 0x556   :  { %1886 = vmatprep.subr.bf16.mxu1 %v2092_v15 }
 0x55c   :  { %1877 = vmatmul.mubr.msk.bf16.vlgmr.msra.gmra.mxu1 %vm171_vm2, %v664_v26 }
 0x55d   :  { %1887 = vmatpush3.bf16.msra.mxu1 %v2354_v27  ;;  %1888 = vmatprep.mubr.msk.bf16.mxu1 %vm2093_vm1, %v2092_v15 }
 0x55e   :  { %1898 = vmatprep.subr.bf16.mxu1 %v2092_v15 }
 0x564   :  { %1889 = vmatmul.mubr.msk.bf16.vlgmr.msra.gmra.mxu1 %vm171_vm2, %v765_v28 }
 0x565   :  { %1900 = vmatprep.mubr.msk.bf16.mxu1 %vm2093_vm1, %v2092_v15 }
 0x578   :  { %v635_v30 = vpop.xlane.xlu0 %634 }
 0x579   :  { %2046 = vrcp.f32 %v635_v30 }
 0x57c   :  { %v862_v32 = vpop.permute.xlu0 %861 }
 0x57d   :  { %v867_v33 = vsel %vm670_vm4, %v862_v32, 0 }
 0x57e   :  { %1899 = vmatpush3.bf16.msra.mxu1 %v867_v33 }
 0x57f   :  { %1910 = vmatprep.subr.bf16.mxu1 %v2092_v15 }
 0x581   :  { %1901 = vmatmul.mubr.msk.bf16.vlgmr.msra.gmra.mxu1 %vm171_vm2, %v860_v34 }
 0x582   :  { %1911 = vmatpush3.bf16.msra.mxu1 %v966_v36  ;;  %1912 = vmatprep.mubr.msk.bf16.mxu1 %vm2093_vm1, %v2092_v15 }
 0x583   :  { %1922 = vmatprep.subr.bf16.mxu1 %v2092_v15 }
 0x586   :  { %v2047_v37 = vpop.eup %2046 }
 0x587   :  { %v659_v35 = vmul.f32 %v2047_v37, %v2319_v59 }
 0x589   :  { %v959_v39 = vpack.c.bf16 %v659_v35, %v659_v35 }
 0x58b   :  { %1913 = vmatmul.mubr.msk.bf16.vlgmr.msra.gmra.mxu1 %vm171_vm2, %v959_v39 }
 0x58c   :  { %1924 = vmatprep.mubr.msk.bf16.mxu1 %vm2093_vm1, %v2092_v15 }
 0x5be   :  { %v641_v43 = vpop.xlane.xlu0 %640 }
 0x5bf   :  { %2048 = vrcp.f32 %v641_v43 }
 0x5c2   :  { %v1110_v44 = vpop.permute.xlu0 %1109 }
 0x5c3   :  { %v1115_v22 = vsel %vm670_vm4, %v1110_v44, 0 }
 0x5c6   :  { %v1060_v45 = vpop.permute.xlu0 %1059 }
 0x5c7   :  { %v1065_v46 = vsel %vm670_vm4, %v1060_v45, 0 }
 0x5c8   :  { %1923 = vmatpush3.bf16.msra.mxu1 %v1065_v46 }
 0x5c9   :  { %1934 = vmatprep.subr.bf16.mxu1 %v2092_v15 }
 0x5cc   :  { %v2049_v20 = vpop.eup %2048 }
 0x5cd   :  { %v661_v24 = vmul.f32 %v2049_v20, %v2327_v8 }
 0x5cf   :  { %v1108_v26 = vpack.c.bf16 %v661_v24, %v661_v24 }
 0x60c   :  { %v416_v47 = vpop.f32.mrf.mxu1 }
 0x60d   :  { %v422_v48 = vsel %vm2263_vm3, %v416_v47, -1e+30 }
 0x60e   :  { %v1854_v49 = vpop.f32.mrf.mxu1  ;;  %v588_v50 = vsel %vm171_vm2, %v422_v48, -inf }
 0x60f   :  { %589 = vmax.xlane.f32.xlu1 %v588_v50 }
 0x610   :  { %v419_v51 = vpop.f32.mrf.mxu1 }
 0x612   :  { %v1855_v52 = vpop.f32.mrf.mxu1 }
 0x614   :  { %v518_v53 = vpop.f32.mrf.mxu1 }
 0x615   :  { %v524_v54 = vsel %vm2263_vm3, %v518_v53, -1e+30 }
 0x616   :  { %v1866_v55 = vpop.f32.mrf.mxu1  ;;  %v594_v56 = vsel %vm171_vm2, %v524_v54, -inf }
 0x617   :  { %595 = vmax.xlane.f32.xlu1 %v594_v56  ;;  %v2440_v56 = vld [vmem:[%s2558_s6] ss:$0 sm:$0xff]  ;;  %s1695_s6 = sshll.u32 %s2105_s17, 4  ;;  %s1696_s6 = int_to_ptr.vmem [resolvable:$true] %s1695_s6 }
 0x618   :  { %v521_v58 = vpop.f32.mrf.mxu1  ;;  %s2070_s18 = scalar_lea.vmem %s1696_s6, 256  ;;  %p2075_p1 = scmp.lt.s32.totalorder %s1696_s6, %s1696_s6 }
 0x619   :  { %p2071_p0 = scmp.ne.s32.totalorder %s1696_s6, %s2070_s18  ;;  %p2076_p2 = scmp.lt.s32.totalorder %s2070_s18, %s2070_s18 }
 0x61a   :  { %v1867_v59 = vpop.f32.mrf.mxu1 }
 0x61b   :  { %598 = vmax.xlane.f32.xlu1 %v597_v60  ;;  %p2077_p3 = por %p2076_p2, %p2075_p1 }
 0x61c   :  { %v708_v62 = vpop.f32.mrf.mxu1 }
 0x61d   :  { %v714_v2 = vpack.c.bf16 %v708_v62, %v708_v62  ;;  %p2078_p4 = pnand %p2077_p3, %p2071_p0 }
 0x61e   :  { %v1878_v4 = vpop.f32.mrf.mxu1 }
 0x61f   :  { %1895 = vmatmul.mubr.msk.bf16.vlgmr.msra.gmra.mxu0 %vm171_vm2, %v714_v2 }
 0x620   :  { %v711_v63 = vpop.f32.mrf.mxu1  ;;  %1905 = vmatpush3.bf16.msra.mxu0 %v2400_v3  ;;  %1906 = vmatprep.mubr.msk.bf16.mxu0 %vm2093_vm1, %v2092_v15 }
 0x621   :  { %1916 = vmatprep.subr.bf16.mxu0 %v2092_v15 }
 0x622   :  { %v1879_v5 = vpop.f32.mrf.mxu1 }
 0x624   :  { %v2407_v6 = vpop.f32.mrf.mxu1 }
 0x626   :  { %v1890_v7 = vpop.f32.mrf.mxu1 }
 0x628   :  { %v811_v9 = vpop.f32.mrf.mxu1 }
 0x62a   :  { %v1891_v10 = vpop.f32.mrf.mxu1 }
 0x641   :  { %v903_v12 = vpop.f32.mrf.mxu1 }
 0x642   :  { %v909_v38 = vpack.c.bf16 %v903_v12, %v903_v12 }
 0x643   :  { %v1902_v14 = vpop.f32.mrf.mxu1 }
 0x644   :  { %1907 = vmatmul.mubr.msk.bf16.vlgmr.msra.gmra.mxu0 %vm171_vm2, %v909_v38 }
 0x645   :  { %v906_v16 = vpop.f32.mrf.mxu1  ;;  %1917 = vmatpush3.bf16.msra.mxu0 %v2413_v13  ;;  %1918 = vmatprep.mubr.msk.bf16.mxu0 %vm2093_vm1, %v2092_v15 }
 0x646   :  { %1928 = vmatprep.subr.bf16.mxu0 %v2092_v15  ;;  %v1340_v16 = vpop.permute.xlu0 %1339 }
 0x647   :  { %v1903_v17 = vpop.f32.mrf.mxu1 }
 0x64b   :  { %v1002_v18 = vpop.f32.mrf.mxu1 }
 0x64c   :  { %v1008_v19 = vpack.c.bf16 %v1002_v18, %v1002_v18 }
 0x64d   :  { %v1914_v21 = vpop.f32.mrf.mxu1 }
 0x64e   :  { %1919 = vmatmul.mubr.msk.bf16.vlgmr.msra.gmra.mxu0 %vm171_vm2, %v1008_v19  ;;  %v1345_v19 = vsel %vm670_vm4, %v1340_v16, 0 }
 0x64f   :  { %1929 = vmatpush3.bf16.msra.mxu0 %v1115_v22  ;;  %v1005_v23 = vpop.f32.mrf.mxu1  ;;  %1930 = vmatprep.mubr.msk.bf16.mxu0 %vm2093_vm1, %v2092_v15 }
 0x650   :  { %1940 = vmatprep.subr.bf16.mxu0 %v2092_v15 }
 0x651   :  { %v1915_v25 = vpop.f32.mrf.mxu1 }
 0x656   :  { %1931 = vmatmul.mubr.msk.bf16.vlgmr.msra.gmra.mxu0 %vm171_vm2, %v1108_v26 }
 0x657   :  { %1941 = vmatpush3.bf16.msra.mxu0 %v2380_v41  ;;  %1942 = vmatprep.mubr.msk.bf16.mxu0 %vm2093_vm1, %v2092_v15 }
 0x658   :  { %1952 = vmatprep.subr.bf16.mxu0 %v2092_v15 }
 0x698   :  { %v590_v28 = vpop.xlane.xlu1 %589 }
 0x699   :  { %v604_v29 = vsub.f32 %v422_v48, %v590_v28 }
 0x69b   :  { %v616_v30 = vmul.f32 1.442695, %v604_v29 }
 0x69d   :  { %2050 = vpow2.f32 %v616_v30 }
 0x6a0   :  { %v596_v31 = vpop.xlane.xlu1 %595 }
 0x6a1   :  { %v606_v32 = vsub.f32 %v524_v54, %v596_v31 }
 0x6a3   :  { %v620_v34 = vmul.f32 1.442695, %v606_v32 }
 0x6a4   :  { %v599_v8 = vpop.xlane.xlu1 %598 }
 0x6a5   :  { %v607_v33 = vsub.f32 %v575_v57, %v599_v8 }
 0x6a7   :  { %v622_v36 = vmul.f32 1.442695, %v607_v33 }
 0x6a9   :  { %2052 = vpow2.f32 %v622_v36 }
 0x6aa   :  { %v2051_v37 = vpop.eup %2050  ;;  %2054 = vpow2.f32 %v620_v34 }
 0x6ab   :  { %v636_v35 = vsel %vm171_vm2, %v2051_v37, 0.0 }
 0x6ac   :  { %637 = vadd.xlane.f32.xlu1 %v636_v35 }
 0x6b6   :  { %v2053_v39 = vpop.eup %2052 }
 0x6b7   :  { %v645_v40 = vsel %vm171_vm2, %v2053_v39, 0.0  ;;  %v2055_v41 = vpop.eup %2054 }
 0x6b8   :  { %646 = vadd.xlane.f32.xlu1 %v645_v40  ;;  %v642_v43 = vsel %vm171_vm2, %v2055_v41, 0.0 }
 0x6bc   :  { %643 = vadd.xlane.f32.xlu1 %v642_v43 }
 0x6cd   :  { %1245 = vrot.lane.b32.xlu1 %v2235_v42, %s2104_s27 }
 0x6df   :  { %v854_v44 = vpop.f32.mrf.mxu0 }
 0x6e0   :  { %v855_v52 = vadd.f32 %v854_v44, %v2407_v6 }
 0x6e1   :  { %v1896_v45 = vpop.f32.mrf.mxu0 }
 0x6e3   :  { %v857_v46 = vpop.f32.mrf.mxu0 }
 0x6e5   :  { %v1897_v47 = vpop.f32.mrf.mxu0 }
 0x704   :  { %v952_v48 = vpop.f32.mrf.mxu0 }
 0x705   :  { %v958_v53 = vadd.f32 %v952_v48, %v855_v52 }
 0x706   :  { %v1908_v49 = vpop.f32.mrf.mxu0 }
 0x708   :  { %v955_v50 = vpop.f32.mrf.mxu0 }
 0x70a   :  { %v1909_v51 = vpop.f32.mrf.mxu0 }
 0x70e   :  { %v1051_v54 = vpop.f32.mrf.mxu0 }
 0x70f   :  { %v1057_v55 = vadd.f32 %v1051_v54, %v958_v53 }
 0x710   :  { %v1920_v57 = vpop.f32.mrf.mxu0 }
 0x711   :  { %v1432_v42 = vadd.f32 %v1057_v55, %v2181_v0 }
 0x712   :  { %v1054_v58 = vpop.f32.mrf.mxu0 }
 0x713   :  { %v2444_v59 = vadd.f32 %v2440_v56, %v1432_v42 }
 0x714   :  { %v1921_v60 = vpop.f32.mrf.mxu0 }
 0x715   :  { %v1445_v61 = vsel %vm50_vm0, %v2444_v59, 0.0 }
 0x716   :  { %1446 = vadd.xlane.f32.xlu0 %v1445_v61  ;;  %v1151_v62 = vpop.f32.mrf.mxu0 }
 0x717   :  { %v1157_v12 = vpack.c.bf16 %v1151_v62, %v1151_v62 }
 0x718   :  { %v1932_v2 = vpop.f32.mrf.mxu0 }
 0x71a   :  { %v1154_v4 = vpop.f32.mrf.mxu0 }
 0x71c   :  { %v1933_v63 = vpop.f32.mrf.mxu0 }
 0x735   :  { %v638_v5 = vpop.xlane.xlu1 %637 }
 0x736   :  { %2056 = vrcp.f32 %v638_v5 }
 0x741   :  { %v647_v6 = vpop.xlane.xlu1 %646 }
 0x743   :  { %v2057_v7 = vpop.eup %2056 }
 0x744   :  { %v660_v9 = vmul.f32 %v2057_v7, %v2051_v37 }
 0x745   :  { %v644_v10 = vpop.xlane.xlu1 %643 }
 0x746   :  { %2058 = vrcp.f32 %v644_v10  ;;  %v1058_v0 = vpack.c.bf16 %v660_v9, %v660_v9 }
 0x747   :  { %2060 = vrcp.f32 %v647_v6 }
 0x748   :  { %1925 = vmatmul.mubr.msk.bf16.vlgmr.msra.gmra.mxu1 %vm171_vm2, %v1058_v0 }
 0x749   :  { %1935 = vmatpush3.bf16.msra.mxu1 %v2354_v27  ;;  %1936 = vmatprep.mubr.msk.bf16.mxu1 %vm2093_vm1, %v2092_v15  ;;  %v1246_v11 = vpop.permute.xlu1 %1245 }
 0x74a   :  { %1946 = vmatprep.subr.bf16.mxu1 %v2092_v15  ;;  %v1251_v38 = vsel %vm670_vm4, %v1246_v11, 0 }
 0x750   :  { %1937 = vmatmul.mubr.msk.bf16.vlgmr.msra.gmra.mxu1 %vm171_vm2, %v1157_v12 }
 0x751   :  { %1947 = vmatpush3.bf16.msra.mxu1 %v1251_v38  ;;  %1948 = vmatprep.mubr.msk.bf16.mxu1 %vm2093_vm1, %v2092_v15 }
 0x752   :  { %1958 = vmatprep.subr.bf16.mxu1 %v2092_v15 }
 0x753   :  { %v2059_v14 = vpop.eup %2058 }
 0x754   :  { %v662_v27 = vmul.f32 %v2059_v14, %v2055_v41  ;;  %v2061_v18 = vpop.eup %2060 }
 0x755   :  { %v663_v20 = vmul.f32 %v2061_v18, %v2053_v39 }
 0x756   :  { %v1244_v17 = vpack.c.bf16 %v662_v27, %v662_v27 }
 0x757   :  { %v1338_v21 = vpack.c.bf16 %v663_v20, %v663_v20 }
 0x758   :  { %1949 = vmatmul.mubr.msk.bf16.vlgmr.msra.gmra.mxu1 %vm171_vm2, %v1244_v17  ;;  %v1740_v17 = vld [vmem:[%s2559_s7] ss:$0 sm:$0xff] }
 0x759   :  { %1959 = vmatpush3.bf16.msra.mxu1 %v1345_v19  ;;  %1960 = vmatprep.mubr.msk.bf16.mxu1 %vm2093_vm1, %v2092_v15 }
 0x75a   :  { %1970 = vmatprep.subr.bf16.mxu1 %v2092_v15 }
 0x760   :  { %1961 = vmatmul.mubr.msk.bf16.vlgmr.msra.gmra.mxu1 %vm171_vm2, %v1338_v21  ;;  %v1741_v21 = vld [vmem:[%s2560_s8] ss:$0 sm:$0xff] }
 0x761   :  { %1974 = vmatprep.mubr.msk.bf16.mxu1 %vm2093_vm1, %v2092_v15 }
 0x79f   :  { %v1447_v22 = vpop.xlane.xlu0 %1446 }
 0x7a0   :  { %v1451_v23 = vmul.f32 0.03125, %v1447_v22 }
 0x7a2   :  { %v2467_v24 = vsub.f32 %v2444_v59, %v1451_v23 }
 0x7a4   :  { %v1455_v25 = vmul.f32 %v2467_v24, %v2467_v24 }
 0x7a6   :  { %v1457_v26 = vsel %vm50_vm0, %v1455_v25, 0.0 }
 0x7a7   :  { %1458 = vadd.xlane.f32.xlu0 %v1457_v26 }
 0x808   :  { %v1101_v28 = vpop.f32.mrf.mxu1 }
 0x809   :  { %v1107_v29 = vpack.c.bf16 %v1101_v28, %v1101_v28  ;;  %v2019_v28 = vld [vmem:[%s2563_s11 + $0x30] sm:$0xff]  }
 0x80a   :  { %v1926_v30 = vpop.f32.mrf.mxu1 }
 0x80b   :  { %1943 = vmatmul.mubr.msk.bf16.vlgmr.msra.gmra.mxu0 %vm171_vm2, %v1107_v29  ;;  %v2020_v29 = vld [vmem:[%s2563_s11 + $0x28] sm:$0xff]   ;;  %v2021_v30 = vld [vmem:[%s2563_s11 + $0x20] sm:$0xff]  }
 0x80c   :  { %v1104_v31 = vpop.f32.mrf.mxu1  ;;  %1953 = vmatpush3.bf16.msra.mxu0 %v2400_v3  ;;  %1954 = vmatprep.mubr.msk.bf16.mxu0 %vm2093_vm1, %v2092_v15 }
 0x80d   :  { %1964 = vmatprep.subr.bf16.mxu0 %v2092_v15  ;;  %v2022_v31 = vld [vmem:[%s2563_s11 + $0x18] sm:$0xff]  }
 0x80e   :  { %v1927_v32 = vpop.f32.mrf.mxu1 }
 0x80f   :  { %v2023_v32 = vld [vmem:[%s2563_s11 + $0x10] sm:$0xff]  }
 0x810   :  { %v1195_v8 = vpop.f32.mrf.mxu1 }
 0x812   :  { %v1938_v33 = vpop.f32.mrf.mxu1 }
 0x813   :  { %v2025_v33 = vld [vmem:[%s2563_s11] sm:$0xff]  }
 0x814   :  { %v1198_v34 = vpop.f32.mrf.mxu1 }
 0x815   :  { %v1742_v34 = vld [vmem:[%s2562_s10] ss:$0 sm:$0xff] }
 0x816   :  { %v1939_v36 = vpop.f32.mrf.mxu1 }
 0x818   :  { %v1287_v37 = vpop.f32.mrf.mxu1 }
 0x819   :  { %v1293_v35 = vpack.c.bf16 %v1287_v37, %v1287_v37 }
 0x81a   :  { %v1950_v39 = vpop.f32.mrf.mxu1 }
 0x81b   :  { %1955 = vmatmul.mubr.msk.bf16.vlgmr.msra.gmra.mxu0 %vm171_vm2, %v1293_v35 }
 0x81c   :  { %v1290_v40 = vpop.f32.mrf.mxu1  ;;  %1965 = vmatpush3.bf16.msra.mxu0 %v2413_v13  ;;  %1966 = vmatprep.mubr.msk.bf16.mxu0 %vm2093_vm1, %v2092_v15 }
 0x81d   :  { %1978 = vmatprep.subr.bf16.mxu0 %v2092_v15 }
 0x81e   :  { %v1951_v3 = vpop.f32.mrf.mxu1 }
 0x820   :  { %v1381_v41 = vpop.f32.mrf.mxu1 }
 0x821   :  { %v1387_v43 = vpack.c.bf16 %v1381_v41, %v1381_v41 }
 0x822   :  { %v1962_v44 = vpop.f32.mrf.mxu1 }
 0x823   :  { %1967 = vmatmul.mubr.msk.bf16.vlgmr.msra.gmra.mxu0 %vm171_vm2, %v1387_v43 }
 0x824   :  { %v1384_v45 = vpop.f32.mrf.mxu1  ;;  %1994 = vmatprep.mubr.msk.bf16.mxu0 %vm2093_vm1, %v2092_v15 }
 0x826   :  { %v1963_v46 = vpop.f32.mrf.mxu1 }
 0x830   :  { %v1459_v10 = vpop.xlane.xlu0 %1458 }
 0x831   :  { %v1463_v0 = vmul.f32 0.03125, %v1459_v10 }
 0x833   :  { %v1465_v11 = vadd.f32 1e-05, %v1463_v0 }
 0x835   :  { %2062 = vrsqrt.f32 %v1465_v11 }
 0x842   :  { %v2063_v27 = vpop.eup %2062 }
 0x843   :  { %v1469_v16 = vmul.f32 %v2063_v27, %v2467_v24  ;;  %v2018_v24 = vld [vmem:[%s2563_s11 + $0x38] sm:$0xff]  }
 0x844   :  { %1979 = vmatpush3.bf16.msra.mxu0 %v2018_v24 }
 0x845   :  { %v1477_v20 = vmul.f32 %v1740_v17, %v1469_v16  ;;  %1980 = vmatprep.subr.bf16.mxu0 %v2092_v15 }
 0x847   :  { %v1485_v23 = vadd.f32 %v1741_v21, %v1477_v20 }
 0x848   :  { %1981 = vmatpush3.bf16.msra.mxu0 %v2019_v28 }
 0x849   :  { %1982 = vmatprep.subr.bf16.mxu0 %v2092_v15 }
 0x84c   :  { %1983 = vmatpush3.bf16.msra.mxu0 %v2020_v29 }
 0x84d   :  { %1984 = vmatprep.subr.bf16.mxu0 %v2092_v15 }
 0x850   :  { %1985 = vmatpush3.bf16.msra.mxu0 %v2021_v30 }
 0x851   :  { %1986 = vmatprep.subr.bf16.mxu0 %v2092_v15 }
 0x854   :  { %1987 = vmatpush3.bf16.msra.mxu0 %v2022_v31 }
 0x855   :  { %1988 = vmatprep.subr.bf16.mxu0 %v2092_v15 }
 0x858   :  { %1989 = vmatpush3.bf16.msra.mxu0 %v2023_v32 }
 0x859   :  { %1990 = vmatprep.subr.bf16.mxu0 %v2092_v15 }
 0x8cb   :  { %v1238_v47 = vpop.f32.mrf.mxu0 }
 0x8cc   :  { %v1239_v53 = vadd.f32 %v1238_v47, %v1195_v8  ;;  %v2024_v8 = vld [vmem:[%s2563_s11 + $0x8] sm:$0xff]  }
 0x8cd   :  { %v1944_v48 = vpop.f32.mrf.mxu0  ;;  %1991 = vmatpush3.bf16.msra.mxu0 %v2024_v8 }
 0x8ce   :  { %1992 = vmatprep.subr.bf16.mxu0 %v2092_v15 }
 0x8cf   :  { %v1241_v49 = vpop.f32.mrf.mxu0 }
 0x8d1   :  { %v1945_v13 = vpop.f32.mrf.mxu0  ;;  %1993 = vmatpush3.bf16.msra.mxu0 %v2025_v33 }
 0x8db   :  { %v1331_v50 = vpop.f32.mrf.mxu0 }
 0x8dc   :  { %v1337_v55 = vadd.f32 %v1331_v50, %v1239_v53 }
 0x8dd   :  { %v1956_v51 = vpop.f32.mrf.mxu0 }
 0x8df   :  { %v1334_v52 = vpop.f32.mrf.mxu0 }
 0x8e1   :  { %v1957_v54 = vpop.f32.mrf.mxu0 }
 0x8e3   :  { %v1425_v57 = vpop.f32.mrf.mxu0 }
 0x8e4   :  { %v1431_v42 = vadd.f32 %v1425_v57, %v1337_v55 }
 0x8e5   :  { %v1968_v58 = vpop.f32.mrf.mxu0 }
 0x8e6   :  { %v1433_v60 = vadd.f32 %v1431_v42, %v2186_v1  ;;  %v2016_v1 = vld [vmem:[%s2561_s9 + $0x8] sm:$0xff]  }
 0x8e7   :  { %v1428_v61 = vpop.f32.mrf.mxu0  ;;  %1971 = vmatpush3.bf16.msra.mxu1 %v2016_v1 }
 0x8e8   :  { %v2487_v62 = vadd.f32 %v2440_v56, %v1433_v60  ;;  %v2017_v56 = vld [vmem:[%s2561_s9] sm:$0xff]   ;;  %1972 = vmatprep.subr.bf16.mxu1 %v2092_v15 }
 0x8e9   :  { %v1969_v2 = vpop.f32.mrf.mxu0  ;;  %v1746_v60 = vld [vmem:[%s2564_s12] ss:$0 sm:$0xff] }
 0x8ea   :  { %v1448_v4 = vsel %vm50_vm0, %v2487_v62, 0.0 }
 0x8eb   :  { %1449 = vadd.xlane.f32.xlu1 %v1448_v4  ;;  %1973 = vmatpush3.bf16.msra.mxu1 %v2017_v56 }
 0x974   :  { %v1450_v63 = vpop.xlane.xlu1 %1449 }
 0x975   :  { %v1452_v5 = vmul.f32 0.03125, %v1450_v63 }
 0x977   :  { %v1454_v6 = vsub.f32 %v2487_v62, %v1452_v5 }
 0x979   :  { %v1456_v7 = vmul.f32 %v1454_v6, %v1454_v6 }
 0x97b   :  { %v1460_v9 = vsel %vm50_vm0, %v1456_v7, 0.0 }
 0x97c   :  { %1461 = vadd.xlane.f32.xlu0 %v1460_v9 }
 0xa05   :  { %v1462_v12 = vpop.xlane.xlu0 %1461 }
 0xa06   :  { %v1464_v38 = vmul.f32 0.03125, %v1462_v12 }
 0xa08   :  { %v1466_v14 = vadd.f32 1e-05, %v1464_v38 }
 0xa0a   :  { %2064 = vrsqrt.f32 %v1466_v14 }
 0xa17   :  { %v2065_v18 = vpop.eup %2064 }
 0xa18   :  { %v1470_v19 = vmul.f32 %v2065_v18, %v1454_v6 }
 0xa1a   :  { %v1478_v22 = vmul.f32 %v1740_v17, %v1470_v19 }
 0xa1c   :  { %v1486_v25 = vadd.f32 %v1741_v21, %v1478_v22 }
 0xa1e   :  { %v1487_v26 = vpack.c.bf16 %v1486_v25, %v1485_v23 }
 0xa20   :  { %1975 = vmatmul.mubr.msk.bf16.vlgmr.msra.gmra.mxu1 %vm50_vm0, %v1487_v26 }
 0xae0   :  { %v1548_v36 = vpop.f32.mrf.mxu1 }
 0xae1   :  { %v1549_v37 = vadd.f32 %v1742_v34, %v1548_v36 }
 0xae2   :  { %v1976_v35 = vpop.f32.mrf.mxu1 }
 0xae3   :  { %v1557_v39 = vmul.f32 %v1549_v37, %v1549_v37  ;;  %v1555_v53 = vmul.f32 0.5, %v1549_v37 }
 0xae4   :  { %v1551_v40 = vpop.f32.mrf.mxu1 }
 0xae5   :  { %v1559_v3 = vmul.f32 %v1557_v39, %v1549_v37  ;;  %v1552_v41 = vadd.f32 %v1742_v34, %v1551_v40 }
 0xae6   :  { %v1977_v43 = vpop.f32.mrf.mxu1 }
 0xae7   :  { %v1561_v44 = vmul.f32 0.044715, %v1559_v3  ;;  %v1558_v45 = vmul.f32 %v1552_v41, %v1552_v41  ;;  %v1556_v54 = vmul.f32 0.5, %v1552_v41 }
 0xae9   :  { %v1563_v46 = vadd.f32 %v1561_v44, %v1549_v37  ;;  %v1560_v47 = vmul.f32 %v1558_v45, %v1552_v41 }
 0xaeb   :  { %v1565_v48 = vmul.f32 0.7978846, %v1563_v46  ;;  %v1562_v49 = vmul.f32 0.044715, %v1560_v47 }
 0xaed   :  { %2066 = vtanh.f32 %v1565_v48  ;;  %v1564_v15 = vadd.f32 %v1562_v49, %v1552_v41 }
 0xaef   :  { %v1566_v13 = vmul.f32 0.7978846, %v1564_v15 }
 0xaf1   :  { %2068 = vtanh.f32 %v1566_v13 }
 0xafa   :  { %v2067_v50 = vpop.eup %2066 }
 0xafb   :  { %v1569_v51 = vadd.f32 1.0, %v2067_v50 }
 0xafd   :  { %v1571_v57 = vmul.f32 %v1569_v51, %v1555_v53 }
 0xafe   :  { %v2069_v52 = vpop.eup %2068 }
 0xaff   :  { %v1570_v55 = vadd.f32 1.0, %v2069_v52 }
 0xb01   :  { %v1572_v42 = vmul.f32 %v1570_v55, %v1556_v54 }
 0xb03   :  { %v1573_v58 = vpack.c.bf16 %v1572_v42, %v1571_v57 }
 0xb05   :  { %1995 = vmatmul.mubr.bf16.vlgmr.msra.gmra.mxu0 %v1573_v58 }
 0xbc5   :  { %v1679_v61 = vpop.f32.mrf.mxu0 }
 0xbc6   :  { %v1680_v2 = vadd.f32 %v1746_v60, %v1679_v61 }
 0xbc7   :  { %v1996_v4 = vpop.f32.mrf.mxu0 }
 0xbc8   :  { %v1686_v63 = vadd.f32 %v1680_v2, %v2444_v59 }
 0xbc9   :  { %v1682_v5 = vpop.f32.mrf.mxu0 }
 0xbca   :  { %1688 = vst.msk [vmem:[#allocation2] sm:$0xff] %vm50_vm0, %v1686_v63  ;;  %v1683_v6 = vadd.f32 %v1746_v60, %v1682_v5 }
 0xbcb   :  { %v1997_v7 = vpop.f32.mrf.mxu0 }
 0xbcc   :  { %v1687_v9 = vadd.f32 %v1683_v6, %v2487_v62 }
 0xbce   :  { %1689 = vst.msk [vmem:[#allocation2 + $0x8] sm:$0xff] %vm50_vm0, %v1687_v9 }
 0xbcf   :  { %2081 = shalt.err (!%p2078_p4)
}
 0xbd0   :  { %s2106_s12 = smov 128   ;;  %s2107_s19 = smov 8  }
 0xbd1   :  { %1701 = dma.vmem_to_hbm [thread:$0]  %s1696_s6, 256, %s2565_s13, [#allocation3], %s2106_s12, %s2106_s12, %s2107_s19  }
 0xbd2   :  { %2090 = dma.done.wait [#allocation3], 256  }
 0xbd3   :  { %2091 = vsyncadd [#allocation3], 4294967040 }
 0xbd4   :  { %1705 = vsyncpa [#allocation3], 1 }

</bundles_post_ra>
